<compile_context>
chip_gen: v7x
topology: tpu7x:2x2x1
jax: 0.10.0
libtpu: 0.0.40
codegen_flags: <defaults>
</compile_context>

<pallas_src>
import functools
import math

import jax
import jax.numpy as jnp
from jax import lax
from jax.experimental import pallas as pl
from jax.experimental.pallas import tpu as pltpu

_HIGH = jax.lax.Precision.HIGHEST
_GELU_C = math.sqrt(2.0 / math.pi)


def _gelu_tanh(v):
    # tanh-approximate GELU (runs on the EUP); max abs deviation from the exact
    # erf form is ~3e-4, far inside the test tolerance.
    return 0.5 * v * (1.0 + jnp.tanh(_GELU_C * (v + 0.044715 * v * v * v)))


def _dot_bf16(a_f32, b_bf16):
    # bf16 inputs, f32 accumulation: single MXU pass.
    return jnp.dot(a_f32.astype(jnp.bfloat16), b_bf16,
                   preferred_element_type=jnp.float32)


def _conv5(g, w_ref, layer, masks):
    """5-tap conv along time of g (R, C) with weights w_ref[layer] (5, C, C) bf16.

    Taps are sublane rolls of g (XLU slot) with edge masks that also zero any
    contribution that would cross a folded-batch boundary."""
    R = g.shape[0]
    acc = None
    for k in range(5):
        s = 2 - k                                   # tap k reads row (t - s)
        if s == 0:
            tap = g
        else:
            rolled = pltpu.roll(g, shift=s % R, axis=0)
            tap = jnp.where(masks[k], rolled, 0.0)
        contrib = _dot_bf16(tap, w_ref[layer, k])
        acc = contrib if acc is None else acc + contrib
    return acc


def decoder_kernel(x_ref, sig_ref, mu_ref, w_in_ref, b_in_ref,
                   c1w_ref, c1b_ref, c2w_ref, c2b_ref,
                   w_out_ref, b_out_ref, o_ref, *, num_layers, t_len):
    # x_ref   : (1, R, Cbn)  with R = b_tile * t_len (batch elems stacked on rows)
    # sig_ref : (1, L, b_tile, C)   mu_ref : (1, L, b_tile, C)   (FiLM, precomputed)
    # c1w_ref : (L, 5, C, C) bf16   c1b_ref: (L, 1, C) f32       (same for conv2)
    # o_ref   : (1, R, Cout_pad)
    R = x_ref.shape[1]
    c_bn = x_ref.shape[2]
    C = w_in_ref.shape[1]
    b_tile = R // t_len

    x = x_ref[0]                                               # (R, Cbn) f32

    # input_layer: 1x1 conv with tiny K (= bottleneck) -> broadcast FMAs on the VPU.
    w_in = w_in_ref[...]                                       # (Cbn, C)
    h = x[:, 0:1] * w_in[0:1, :] + b_in_ref[...]
    for c in range(1, c_bn):
        h = h + x[:, c:c + 1] * w_in[c:c + 1, :]               # (R, C) f32

    # Per-tap validity masks, hoisted out of the layer loop.
    # row-in-batch index for every row of the folded tile.
    rib = lax.broadcasted_iota(jnp.int32, (b_tile, t_len, C), 1).reshape(R, C)
    masks = {0: rib >= 2, 1: rib >= 1,
             3: rib < t_len - 1, 4: rib < t_len - 2}

    def rows(v):                                               # (b_tile, C) -> (R, C)
        return jnp.broadcast_to(v[:, None, :], (b_tile, t_len, C)).reshape(R, C)

    for l in range(num_layers):
        res = h
        a = _conv5(_gelu_tanh(h), c1w_ref, l, masks) + c1b_ref[l]   # conv1(gelu(h))
        y = _conv5(_gelu_tanh(a), c2w_ref, l, masks) + c2b_ref[l]   # conv2(gelu(a))
        sigma = rows(sig_ref[0, l])                                 # (R, C)
        mu = rows(mu_ref[0, l])
        h = y * sigma + mu + res

    # output_layer: 1x1 conv (Cout padded to a 128-lane multiple -> unmasked stores)
    out = _dot_bf16(h, w_out_ref[...]) + b_out_ref[...]
    o_ref[0] = out.astype(o_ref.dtype)


def _pick_batch_tile(batch, t_len, max_rows=512):
    """Fold whole batch elements into the row dimension so the matmul M is B_tile*T."""
    if t_len % 8 != 0:          # keep the (b_tile, T, C) <-> (R, C) reshape layout-free
        return 1
    best = 1
    for cand in range(1, batch + 1):
        if batch % cand == 0 and cand * t_len <= max_rows:
            best = cand
    return best


def decoder_pallas(params, x, spk):
    """x: (B, bottleneck, T), spk: (B, dim_spk, 1)  ->  (B, output_channels, T)."""
    B, c_bn, T = x.shape
    L = params["c1_w"].shape[0]
    C = params["w_in"].shape[0]
    c_out = params["w_out"].shape[0]
    c_out_pad = ((c_out + 127) // 128) * 128

    b_tile = _pick_batch_tile(B, T)
    nb = B // b_tile
    R = b_tile * T

    f32, bf16 = jnp.float32, jnp.bfloat16

    # ---- layout plumbing (plain JAX glue) ----
    x_k = jnp.transpose(x, (0, 2, 1)).astype(f32).reshape(nb, R, c_bn)

    # FiLM sigma/mu: 1x1 convs of the speaker embedding, precomputed per (batch, layer)
    # so no M=1 matmuls hit the MXU and mu_w/sg_w never occupy VMEM.
    spk2 = spk[:, :, 0].astype(f32)                                         # (B, Dspk)
    sigma = jnp.einsum("bd,lcd->blc", spk2, params["sg_w"][..., 0].astype(f32),
                       precision=_HIGH) + params["sg_b"][None]
    mu = jnp.einsum("bd,lcd->blc", spk2, params["mu_w"][..., 0].astype(f32),
                    precision=_HIGH) + params["mu_b"][None]
    sigma = jnp.transpose(sigma.reshape(nb, b_tile, L, C), (0, 2, 1, 3))    # (nb,L,bt,C)
    mu = jnp.transpose(mu.reshape(nb, b_tile, L, C), (0, 2, 1, 3))

    w_in = jnp.transpose(params["w_in"][:, :, 0], (1, 0)).astype(f32)       # (Cbn, C)
    b_in = params["b_in"][None, :].astype(f32)                              # (1, C)
    c1w = jnp.transpose(params["c1_w"], (0, 3, 2, 1)).astype(bf16)          # (L,5,Cin,Cout)
    c1b = params["c1_b"][:, None, :].astype(f32)                            # (L, 1, C)
    c2w = jnp.transpose(params["c2_w"], (0, 3, 2, 1)).astype(bf16)
    c2b = params["c2_b"][:, None, :].astype(f32)
    w_out = jnp.transpose(params["w_out"][:, :, 0], (1, 0))                 # (C, Cout)
    w_out = jnp.pad(w_out, ((0, 0), (0, c_out_pad - c_out))).astype(bf16)   # lane-dense
    b_out = jnp.pad(params["b_out"], (0, c_out_pad - c_out))[None, :].astype(f32)

    def full_spec(a):
        n = a.ndim
        return pl.BlockSpec(a.shape, lambda b, n=n: (0,) * n)

    # NOTE: for production-sized configs (C>=512, L>=8) the c1w/c2w stacks should be
    # streamed per layer (manual double-buffered DMA) instead of held fully resident,
    # to stay inside v7x's 64 MiB VMEM; at this config everything fits comfortably.
    out = pl.pallas_call(
        functools.partial(decoder_kernel, num_layers=L, t_len=T),
        out_shape=jax.ShapeDtypeStruct((nb, R, c_out_pad), f32),
        grid=(nb,),
        in_specs=[
            pl.BlockSpec((1, R, c_bn), lambda b: (b, 0, 0)),
            pl.BlockSpec((1, L, b_tile, C), lambda b: (b, 0, 0, 0)),
            pl.BlockSpec((1, L, b_tile, C), lambda b: (b, 0, 0, 0)),
            full_spec(w_in), full_spec(b_in),
            full_spec(c1w), full_spec(c1b),
            full_spec(c2w), full_spec(c2b),
            full_spec(w_out), full_spec(b_out),
        ],
        out_specs=pl.BlockSpec((1, R, c_out_pad), lambda b: (b, 0, 0)),
        compiler_params=pltpu.CompilerParams(
            dimension_semantics=("parallel",),
            vmem_limit_bytes=48 * 1024 * 1024,
        ),
    )(x_k, sigma, mu, w_in, b_in, c1w, c1b, c2w, c2b, w_out, b_out)

    out = out.reshape(B, T, c_out_pad)[:, :, :c_out]
    return jnp.transpose(out, (0, 2, 1))                                    # (B, Cout, T)


# ---------------- pure-JAX reference (mirrors the PyTorch module, f32 exact) --------
def _conv1d_ref(x, w, b, pad):
    out = jax.lax.conv_general_dilated(
        x, w, window_strides=(1,), padding=[(pad, pad)],
        dimension_numbers=("NCH", "OIH", "NCH"), precision=_HIGH)
    return out + b[None, :, None]


def decoder_ref(params, x, spk):
    gelu = lambda v: jax.nn.gelu(v, approximate=False)
    h = _conv1d_ref(x, params["w_in"], params["b_in"], 0)
    L = params["c1_w"].shape[0]
    for l in range(L):
        res = h
        a = _conv1d_ref(gelu(h), params["c1_w"][l], params["c1_b"][l], 2)
        a = _conv1d_ref(gelu(a), params["c2_w"][l], params["c2_b"][l], 2)
        sigma = _conv1d_ref(spk, params["sg_w"][l], params["sg_b"][l], 0)
        mu = _conv1d_ref(spk, params["mu_w"][l], params["mu_b"][l], 0)
        h = a * sigma + mu + res
    return _conv1d_ref(h, params["w_out"], params["b_out"], 0)


# ---------------- deterministic parameter init (PyTorch Conv1d-style) ----------------
def _init_conv(key, cout, cin, k):
    kw, kb = jax.random.split(key)
    bound = 1.0 / math.sqrt(cin * k)
    w = jax.random.uniform(kw, (cout, cin, k), jnp.float32, -bound, bound)
    b = jax.random.uniform(kb, (cout,), jnp.float32, -bound, bound)
    return w, b


def build_params(key, bottleneck, output_channels, internal_channels, num_layers, dim_spk):
    keys = jax.random.split(key, 2 + 4 * num_layers)
    w_in, b_in = _init_conv(keys[0], internal_channels, bottleneck, 1)
    w_out, b_out = _init_conv(keys[1], output_channels, internal_channels, 1)
    c1w, c1b, c2w, c2b, muw, mub, sgw, sgb = [], [], [], [], [], [], [], []
    for l in range(num_layers):
        k1, k2, k3, k4 = keys[2 + 4 * l: 2 + 4 * (l + 1)]
        w, b = _init_conv(k1, internal_channels, internal_channels, 5); c1w.append(w); c1b.append(b)
        w, b = _init_conv(k2, internal_channels, internal_channels, 5); c2w.append(w); c2b.append(b)
        w, b = _init_conv(k3, internal_channels, dim_spk, 1); muw.append(w); mub.append(b)
        w, b = _init_conv(k4, internal_channels, dim_spk, 1); sgw.append(w); sgb.append(b)
    stack = lambda xs: jnp.stack(xs, axis=0)
    return dict(
        w_in=w_in, b_in=b_in, w_out=w_out, b_out=b_out,
        c1_w=stack(c1w), c1_b=stack(c1b), c2_w=stack(c2w), c2_b=stack(c2b),
        mu_w=stack(muw), mu_b=stack(mub), sg_w=stack(sgw), sg_b=stack(sgb),
    )


if __name__ == "__main__":
    # Small but structure-preserving configuration of Decoder(...)
    B, T = 2, 16
    bottleneck, output_channels, internal_channels, num_layers, dim_spk = 4, 192, 128, 2, 128

    key = jax.random.PRNGKey(0)
    kp, kx, ks = jax.random.split(key, 3)
    params = build_params(kp, bottleneck, output_channels, internal_channels, num_layers, dim_spk)

    x = jax.random.normal(kx, (B, bottleneck, T), jnp.float32)        # PyTorch NCT layout
    spk = jax.random.normal(ks, (B, dim_spk, 1), jnp.float32)         # speaker embedding

    out = decoder_pallas(params, x, spk)
    out = jax.block_until_ready(out)

    ref = decoder_ref(params, x, spk)
    err = float(jnp.max(jnp.abs(out - ref)))
    scale = float(jnp.maximum(1.0, jnp.max(jnp.abs(ref))))
    assert out.shape == (B, output_channels, T), out.shape
    assert err / scale < 2e-2, f"mismatch: max abs err {err} (scale {scale})"
    print("KERNEL_OK")
</pallas_src>

<mosaic_0001>
module attributes {stable_mosaic.version = 11 : i64} {
  func.func @decoder_kernel(%arg0: i32, %arg1: memref<1x32x4xf32, #tpu.memory_space<vmem>>, %arg2: memref<1x2x2x128xf32, #tpu.memory_space<vmem>>, %arg3: memref<1x2x2x128xf32, #tpu.memory_space<vmem>>, %arg4: memref<4x128xf32, #tpu.memory_space<vmem>>, %arg5: memref<1x128xf32, #tpu.memory_space<vmem>>, %arg6: memref<2x5x128x128xbf16, #tpu.memory_space<vmem>>, %arg7: memref<2x1x128xf32, #tpu.memory_space<vmem>>, %arg8: memref<2x5x128x128xbf16, #tpu.memory_space<vmem>>, %arg9: memref<2x1x128xf32, #tpu.memory_space<vmem>>, %arg10: memref<128x256xbf16, #tpu.memory_space<vmem>>, %arg11: memref<1x256xf32, #tpu.memory_space<vmem>>, %arg12: memref<1x32x256xf32, #tpu.memory_space<vmem>>) attributes {dimension_semantics = [#tpu.dimension_semantics<parallel>], iteration_bounds = array<i64: 1>, scalar_prefetch = 0 : i64, scratch_operands = 0 : i64, tpu.core_type = #tpu.core_type<tc>, window_params = [{transform_indices = @transform_0, window_bounds = array<i64: 1, 32, 4>}, {transform_indices = @transform_1, window_bounds = array<i64: 1, 2, 2, 128>}, {transform_indices = @transform_2, window_bounds = array<i64: 1, 2, 2, 128>}, {pipeline_mode = #tpu.pipeline_mode<synchronous>, transform_indices = @transform_3, window_bounds = array<i64: 4, 128>}, {pipeline_mode = #tpu.pipeline_mode<synchronous>, transform_indices = @transform_4, window_bounds = array<i64: 1, 128>}, {pipeline_mode = #tpu.pipeline_mode<synchronous>, transform_indices = @transform_5, window_bounds = array<i64: 2, 5, 128, 128>}, {pipeline_mode = #tpu.pipeline_mode<synchronous>, transform_indices = @transform_6, window_bounds = array<i64: 2, 1, 128>}, {pipeline_mode = #tpu.pipeline_mode<synchronous>, transform_indices = @transform_7, window_bounds = array<i64: 2, 5, 128, 128>}, {pipeline_mode = #tpu.pipeline_mode<synchronous>, transform_indices = @transform_8, window_bounds = array<i64: 2, 1, 128>}, {pipeline_mode = #tpu.pipeline_mode<synchronous>, transform_indices = @transform_9, window_bounds = array<i64: 128, 256>}, {pipeline_mode = #tpu.pipeline_mode<synchronous>, transform_indices = @transform_10, window_bounds = array<i64: 1, 256>}, {transform_indices = @transform_11, window_bounds = array<i64: 1, 32, 256>}]} {
    %c0 = arith.constant 0 : index
    %c0_0 = arith.constant 0 : index
    %c0_1 = arith.constant 0 : index
    %0 = vector.load %arg1[%c0, %c0_0, %c0_1] : memref<1x32x4xf32, #tpu.memory_space<vmem>>, vector<1x32x4xf32>
    %1 = vector.shape_cast %0 : vector<1x32x4xf32> to vector<32x4xf32>
    %c0_2 = arith.constant 0 : index
    %c0_3 = arith.constant 0 : index
    %2 = vector.load %arg4[%c0_2, %c0_3] : memref<4x128xf32, #tpu.memory_space<vmem>>, vector<4x128xf32>
    %3 = vector.extract_strided_slice %1 {offsets = [0, 0], sizes = [32, 1], strides = [1, 1]} : vector<32x4xf32> to vector<32x1xf32>
    %4 = vector.extract_strided_slice %2 {offsets = [0, 0], sizes = [1, 128], strides = [1, 1]} : vector<4x128xf32> to vector<1x128xf32>
    %5 = vector.broadcast %3 : vector<32x1xf32> to vector<32x128xf32>
    %6 = vector.broadcast %4 : vector<1x128xf32> to vector<32x128xf32>
    %7 = arith.mulf %5, %6 : vector<32x128xf32>
    %c0_4 = arith.constant 0 : index
    %c0_5 = arith.constant 0 : index
    %8 = vector.load %arg5[%c0_4, %c0_5] : memref<1x128xf32, #tpu.memory_space<vmem>>, vector<1x128xf32>
    %9 = vector.broadcast %8 : vector<1x128xf32> to vector<32x128xf32>
    %10 = arith.addf %7, %9 : vector<32x128xf32>
    %11 = vector.extract_strided_slice %1 {offsets = [0, 1], sizes = [32, 1], strides = [1, 1]} : vector<32x4xf32> to vector<32x1xf32>
    %12 = vector.extract_strided_slice %2 {offsets = [1, 0], sizes = [1, 128], strides = [1, 1]} : vector<4x128xf32> to vector<1x128xf32>
    %13 = vector.broadcast %11 : vector<32x1xf32> to vector<32x128xf32>
    %14 = vector.broadcast %12 : vector<1x128xf32> to vector<32x128xf32>
    %15 = arith.mulf %13, %14 : vector<32x128xf32>
    %16 = arith.addf %10, %15 : vector<32x128xf32>
    %17 = vector.extract_strided_slice %1 {offsets = [0, 2], sizes = [32, 1], strides = [1, 1]} : vector<32x4xf32> to vector<32x1xf32>
    %18 = vector.extract_strided_slice %2 {offsets = [2, 0], sizes = [1, 128], strides = [1, 1]} : vector<4x128xf32> to vector<1x128xf32>
    %19 = vector.broadcast %17 : vector<32x1xf32> to vector<32x128xf32>
    %20 = vector.broadcast %18 : vector<1x128xf32> to vector<32x128xf32>
    %21 = arith.mulf %19, %20 : vector<32x128xf32>
    %22 = arith.addf %16, %21 : vector<32x128xf32>
    %23 = vector.extract_strided_slice %1 {offsets = [0, 3], sizes = [32, 1], strides = [1, 1]} : vector<32x4xf32> to vector<32x1xf32>
    %24 = vector.extract_strided_slice %2 {offsets = [3, 0], sizes = [1, 128], strides = [1, 1]} : vector<4x128xf32> to vector<1x128xf32>
    %25 = vector.broadcast %23 : vector<32x1xf32> to vector<32x128xf32>
    %26 = vector.broadcast %24 : vector<1x128xf32> to vector<32x128xf32>
    %27 = arith.mulf %25, %26 : vector<32x128xf32>
    %28 = arith.addf %22, %27 : vector<32x128xf32>
    %29 = tpu.iota {dimensions = array<i32: 1>} : vector<2x16x128xi32>
    %30 = vector.shape_cast %29 : vector<2x16x128xi32> to vector<32x128xi32>
    %c2_i32 = arith.constant 2 : i32
    %31 = vector.broadcast %c2_i32 : i32 to vector<32x128xi32>
    %32 = arith.cmpi sge, %30, %31 : vector<32x128xi32>
    %c1_i32 = arith.constant 1 : i32
    %33 = vector.broadcast %c1_i32 : i32 to vector<32x128xi32>
    %34 = arith.cmpi sge, %30, %33 : vector<32x128xi32>
    %c15_i32 = arith.constant 15 : i32
    %35 = vector.broadcast %c15_i32 : i32 to vector<32x128xi32>
    %36 = arith.cmpi slt, %30, %35 : vector<32x128xi32>
    %c14_i32 = arith.constant 14 : i32
    %37 = vector.broadcast %c14_i32 : i32 to vector<32x128xi32>
    %38 = arith.cmpi slt, %30, %37 : vector<32x128xi32>
    %cst = arith.constant 5.000000e-01 : f32
    %39 = vector.broadcast %cst : f32 to vector<32x128xf32>
    %40 = arith.mulf %39, %28 : vector<32x128xf32>
    %cst_6 = arith.constant 4.471500e-02 : f32
    %41 = vector.broadcast %cst_6 : f32 to vector<32x128xf32>
    %42 = arith.mulf %41, %28 : vector<32x128xf32>
    %43 = arith.mulf %42, %28 : vector<32x128xf32>
    %44 = arith.mulf %43, %28 : vector<32x128xf32>
    %45 = arith.addf %28, %44 : vector<32x128xf32>
    %cst_7 = arith.constant 0.797884583 : f32
    %46 = vector.broadcast %cst_7 : f32 to vector<32x128xf32>
    %47 = arith.mulf %46, %45 : vector<32x128xf32>
    %48 = math.tanh %47 : vector<32x128xf32>
    %cst_8 = arith.constant 1.000000e+00 : f32
    %49 = vector.broadcast %cst_8 : f32 to vector<32x128xf32>
    %50 = arith.addf %49, %48 : vector<32x128xf32>
    %51 = arith.mulf %40, %50 : vector<32x128xf32>
    %c2_i32_9 = arith.constant 2 : i32
    %52 = tpu.dynamic_rotate %51 by %c2_i32_9 dim 0 : vector<32x128xf32>, i32 -> vector<32x128xf32>
    %cst_10 = arith.constant 0.000000e+00 : f32
    %53 = vector.broadcast %cst_10 : f32 to vector<32x128xf32>
    %54 = arith.select %32, %52, %53 : vector<32x128xi1>, vector<32x128xf32>
    %c0_11 = arith.constant 0 : index
    %c0_12 = arith.constant 0 : index
    %c0_13 = arith.constant 0 : index
    %c0_14 = arith.constant 0 : index
    %55 = vector.load %arg6[%c0_11, %c0_12, %c0_13, %c0_14] : memref<2x5x128x128xbf16, #tpu.memory_space<vmem>>, vector<1x1x128x128xbf16>
    %56 = vector.shape_cast %55 : vector<1x1x128x128xbf16> to vector<128x128xbf16>
    %57 = arith.truncf %54 : vector<32x128xf32> to vector<32x128xbf16>
    %cst_15 = arith.constant dense<0.000000e+00> : vector<32x128xf32>
    %58 = tpu.matmul %57, %56, %cst_15 {dimension_numbers = #tpu.dot_dimension_numbers<[1], [0], [0], [1], [0, 0, 1, 1], [], []>} : vector<32x128xbf16>, vector<128x128xbf16>, vector<32x128xf32> -> vector<32x128xf32>
    %c1_i32_16 = arith.constant 1 : i32
    %59 = tpu.dynamic_rotate %51 by %c1_i32_16 dim 0 : vector<32x128xf32>, i32 -> vector<32x128xf32>
    %cst_17 = arith.constant 0.000000e+00 : f32
    %60 = vector.broadcast %cst_17 : f32 to vector<32x128xf32>
    %61 = arith.select %34, %59, %60 : vector<32x128xi1>, vector<32x128xf32>
    %c0_18 = arith.constant 0 : index
    %c1 = arith.constant 1 : index
    %c0_19 = arith.constant 0 : index
    %c0_20 = arith.constant 0 : index
    %62 = vector.load %arg6[%c0_18, %c1, %c0_19, %c0_20] : memref<2x5x128x128xbf16, #tpu.memory_space<vmem>>, vector<1x1x128x128xbf16>
    %63 = vector.shape_cast %62 : vector<1x1x128x128xbf16> to vector<128x128xbf16>
    %64 = arith.truncf %61 : vector<32x128xf32> to vector<32x128xbf16>
    %cst_21 = arith.constant dense<0.000000e+00> : vector<32x128xf32>
    %65 = tpu.matmul %64, %63, %cst_21 {dimension_numbers = #tpu.dot_dimension_numbers<[1], [0], [0], [1], [0, 0, 1, 1], [], []>} : vector<32x128xbf16>, vector<128x128xbf16>, vector<32x128xf32> -> vector<32x128xf32>
    %66 = arith.addf %58, %65 : vector<32x128xf32>
    %c0_22 = arith.constant 0 : index
    %c2 = arith.constant 2 : index
    %c0_23 = arith.constant 0 : index
    %c0_24 = arith.constant 0 : index
    %67 = vector.load %arg6[%c0_22, %c2, %c0_23, %c0_24] : memref<2x5x128x128xbf16, #tpu.memory_space<vmem>>, vector<1x1x128x128xbf16>
    %68 = vector.shape_cast %67 : vector<1x1x128x128xbf16> to vector<128x128xbf16>
    %69 = arith.truncf %51 : vector<32x128xf32> to vector<32x128xbf16>
    %cst_25 = arith.constant dense<0.000000e+00> : vector<32x128xf32>
    %70 = tpu.matmul %69, %68, %cst_25 {dimension_numbers = #tpu.dot_dimension_numbers<[1], [0], [0], [1], [0, 0, 1, 1], [], []>} : vector<32x128xbf16>, vector<128x128xbf16>, vector<32x128xf32> -> vector<32x128xf32>
    %71 = arith.addf %66, %70 : vector<32x128xf32>
    %c31_i32 = arith.constant 31 : i32
    %72 = tpu.dynamic_rotate %51 by %c31_i32 dim 0 : vector<32x128xf32>, i32 -> vector<32x128xf32>
    %cst_26 = arith.constant 0.000000e+00 : f32
    %73 = vector.broadcast %cst_26 : f32 to vector<32x128xf32>
    %74 = arith.select %36, %72, %73 : vector<32x128xi1>, vector<32x128xf32>
    %c0_27 = arith.constant 0 : index
    %c3 = arith.constant 3 : index
    %c0_28 = arith.constant 0 : index
    %c0_29 = arith.constant 0 : index
    %75 = vector.load %arg6[%c0_27, %c3, %c0_28, %c0_29] : memref<2x5x128x128xbf16, #tpu.memory_space<vmem>>, vector<1x1x128x128xbf16>
    %76 = vector.shape_cast %75 : vector<1x1x128x128xbf16> to vector<128x128xbf16>
    %77 = arith.truncf %74 : vector<32x128xf32> to vector<32x128xbf16>
    %cst_30 = arith.constant dense<0.000000e+00> : vector<32x128xf32>
    %78 = tpu.matmul %77, %76, %cst_30 {dimension_numbers = #tpu.dot_dimension_numbers<[1], [0], [0], [1], [0, 0, 1, 1], [], []>} : vector<32x128xbf16>, vector<128x128xbf16>, vector<32x128xf32> -> vector<32x128xf32>
    %79 = arith.addf %71, %78 : vector<32x128xf32>
    %c30_i32 = arith.constant 30 : i32
    %80 = tpu.dynamic_rotate %51 by %c30_i32 dim 0 : vector<32x128xf32>, i32 -> vector<32x128xf32>
    %cst_31 = arith.constant 0.000000e+00 : f32
    %81 = vector.broadcast %cst_31 : f32 to vector<32x128xf32>
    %82 = arith.select %38, %80, %81 : vector<32x128xi1>, vector<32x128xf32>
    %c0_32 = arith.constant 0 : index
    %c4 = arith.constant 4 : index
    %c0_33 = arith.constant 0 : index
    %c0_34 = arith.constant 0 : index
    %83 = vector.load %arg6[%c0_32, %c4, %c0_33, %c0_34] : memref<2x5x128x128xbf16, #tpu.memory_space<vmem>>, vector<1x1x128x128xbf16>
    %84 = vector.shape_cast %83 : vector<1x1x128x128xbf16> to vector<128x128xbf16>
    %85 = arith.truncf %82 : vector<32x128xf32> to vector<32x128xbf16>
    %cst_35 = arith.constant dense<0.000000e+00> : vector<32x128xf32>
    %86 = tpu.matmul %85, %84, %cst_35 {dimension_numbers = #tpu.dot_dimension_numbers<[1], [0], [0], [1], [0, 0, 1, 1], [], []>} : vector<32x128xbf16>, vector<128x128xbf16>, vector<32x128xf32> -> vector<32x128xf32>
    %87 = arith.addf %79, %86 : vector<32x128xf32>
    %c0_36 = arith.constant 0 : index
    %c0_37 = arith.constant 0 : index
    %c0_38 = arith.constant 0 : index
    %88 = vector.load %arg7[%c0_36, %c0_37, %c0_38] : memref<2x1x128xf32, #tpu.memory_space<vmem>>, vector<1x1x128xf32>
    %89 = vector.shape_cast %88 : vector<1x1x128xf32> to vector<1x128xf32>
    %90 = vector.broadcast %89 : vector<1x128xf32> to vector<32x128xf32>
    %91 = arith.addf %87, %90 : vector<32x128xf32>
    %cst_39 = arith.constant 5.000000e-01 : f32
    %92 = vector.broadcast %cst_39 : f32 to vector<32x128xf32>
    %93 = arith.mulf %92, %91 : vector<32x128xf32>
    %cst_40 = arith.constant 4.471500e-02 : f32
    %94 = vector.broadcast %cst_40 : f32 to vector<32x128xf32>
    %95 = arith.mulf %94, %91 : vector<32x128xf32>
    %96 = arith.mulf %95, %91 : vector<32x128xf32>
    %97 = arith.mulf %96, %91 : vector<32x128xf32>
    %98 = arith.addf %91, %97 : vector<32x128xf32>
    %cst_41 = arith.constant 0.797884583 : f32
    %99 = vector.broadcast %cst_41 : f32 to vector<32x128xf32>
    %100 = arith.mulf %99, %98 : vector<32x128xf32>
    %101 = math.tanh %100 : vector<32x128xf32>
    %cst_42 = arith.constant 1.000000e+00 : f32
    %102 = vector.broadcast %cst_42 : f32 to vector<32x128xf32>
    %103 = arith.addf %102, %101 : vector<32x128xf32>
    %104 = arith.mulf %93, %103 : vector<32x128xf32>
    %c2_i32_43 = arith.constant 2 : i32
    %105 = tpu.dynamic_rotate %104 by %c2_i32_43 dim 0 : vector<32x128xf32>, i32 -> vector<32x128xf32>
    %cst_44 = arith.constant 0.000000e+00 : f32
    %106 = vector.broadcast %cst_44 : f32 to vector<32x128xf32>
    %107 = arith.select %32, %105, %106 : vector<32x128xi1>, vector<32x128xf32>
    %c0_45 = arith.constant 0 : index
    %c0_46 = arith.constant 0 : index
    %c0_47 = arith.constant 0 : index
    %c0_48 = arith.constant 0 : index
    %108 = vector.load %arg8[%c0_45, %c0_46, %c0_47, %c0_48] : memref<2x5x128x128xbf16, #tpu.memory_space<vmem>>, vector<1x1x128x128xbf16>
    %109 = vector.shape_cast %108 : vector<1x1x128x128xbf16> to vector<128x128xbf16>
    %110 = arith.truncf %107 : vector<32x128xf32> to vector<32x128xbf16>
    %cst_49 = arith.constant dense<0.000000e+00> : vector<32x128xf32>
    %111 = tpu.matmul %110, %109, %cst_49 {dimension_numbers = #tpu.dot_dimension_numbers<[1], [0], [0], [1], [0, 0, 1, 1], [], []>} : vector<32x128xbf16>, vector<128x128xbf16>, vector<32x128xf32> -> vector<32x128xf32>
    %c1_i32_50 = arith.constant 1 : i32
    %112 = tpu.dynamic_rotate %104 by %c1_i32_50 dim 0 : vector<32x128xf32>, i32 -> vector<32x128xf32>
    %cst_51 = arith.constant 0.000000e+00 : f32
    %113 = vector.broadcast %cst_51 : f32 to vector<32x128xf32>
    %114 = arith.select %34, %112, %113 : vector<32x128xi1>, vector<32x128xf32>
    %c0_52 = arith.constant 0 : index
    %c1_53 = arith.constant 1 : index
    %c0_54 = arith.constant 0 : index
    %c0_55 = arith.constant 0 : index
    %115 = vector.load %arg8[%c0_52, %c1_53, %c0_54, %c0_55] : memref<2x5x128x128xbf16, #tpu.memory_space<vmem>>, vector<1x1x128x128xbf16>
    %116 = vector.shape_cast %115 : vector<1x1x128x128xbf16> to vector<128x128xbf16>
    %117 = arith.truncf %114 : vector<32x128xf32> to vector<32x128xbf16>
    %cst_56 = arith.constant dense<0.000000e+00> : vector<32x128xf32>
    %118 = tpu.matmul %117, %116, %cst_56 {dimension_numbers = #tpu.dot_dimension_numbers<[1], [0], [0], [1], [0, 0, 1, 1], [], []>} : vector<32x128xbf16>, vector<128x128xbf16>, vector<32x128xf32> -> vector<32x128xf32>
    %119 = arith.addf %111, %118 : vector<32x128xf32>
    %c0_57 = arith.constant 0 : index
    %c2_58 = arith.constant 2 : index
    %c0_59 = arith.constant 0 : index
    %c0_60 = arith.constant 0 : index
    %120 = vector.load %arg8[%c0_57, %c2_58, %c0_59, %c0_60] : memref<2x5x128x128xbf16, #tpu.memory_space<vmem>>, vector<1x1x128x128xbf16>
    %121 = vector.shape_cast %120 : vector<1x1x128x128xbf16> to vector<128x128xbf16>
    %122 = arith.truncf %104 : vector<32x128xf32> to vector<32x128xbf16>
    %cst_61 = arith.constant dense<0.000000e+00> : vector<32x128xf32>
    %123 = tpu.matmul %122, %121, %cst_61 {dimension_numbers = #tpu.dot_dimension_numbers<[1], [0], [0], [1], [0, 0, 1, 1], [], []>} : vector<32x128xbf16>, vector<128x128xbf16>, vector<32x128xf32> -> vector<32x128xf32>
    %124 = arith.addf %119, %123 : vector<32x128xf32>
    %c31_i32_62 = arith.constant 31 : i32
    %125 = tpu.dynamic_rotate %104 by %c31_i32_62 dim 0 : vector<32x128xf32>, i32 -> vector<32x128xf32>
    %cst_63 = arith.constant 0.000000e+00 : f32
    %126 = vector.broadcast %cst_63 : f32 to vector<32x128xf32>
    %127 = arith.select %36, %125, %126 : vector<32x128xi1>, vector<32x128xf32>
    %c0_64 = arith.constant 0 : index
    %c3_65 = arith.constant 3 : index
    %c0_66 = arith.constant 0 : index
    %c0_67 = arith.constant 0 : index
    %128 = vector.load %arg8[%c0_64, %c3_65, %c0_66, %c0_67] : memref<2x5x128x128xbf16, #tpu.memory_space<vmem>>, vector<1x1x128x128xbf16>
    %129 = vector.shape_cast %128 : vector<1x1x128x128xbf16> to vector<128x128xbf16>
    %130 = arith.truncf %127 : vector<32x128xf32> to vector<32x128xbf16>
    %cst_68 = arith.constant dense<0.000000e+00> : vector<32x128xf32>
    %131 = tpu.matmul %130, %129, %cst_68 {dimension_numbers = #tpu.dot_dimension_numbers<[1], [0], [0], [1], [0, 0, 1, 1], [], []>} : vector<32x128xbf16>, vector<128x128xbf16>, vector<32x128xf32> -> vector<32x128xf32>
    %132 = arith.addf %124, %131 : vector<32x128xf32>
    %c30_i32_69 = arith.constant 30 : i32
    %133 = tpu.dynamic_rotate %104 by %c30_i32_69 dim 0 : vector<32x128xf32>, i32 -> vector<32x128xf32>
    %cst_70 = arith.constant 0.000000e+00 : f32
    %134 = vector.broadcast %cst_70 : f32 to vector<32x128xf32>
    %135 = arith.select %38, %133, %134 : vector<32x128xi1>, vector<32x128xf32>
    %c0_71 = arith.constant 0 : index
    %c4_72 = arith.constant 4 : index
    %c0_73 = arith.constant 0 : index
    %c0_74 = arith.constant 0 : index
    %136 = vector.load %arg8[%c0_71, %c4_72, %c0_73, %c0_74] : memref<2x5x128x128xbf16, #tpu.memory_space<vmem>>, vector<1x1x128x128xbf16>
    %137 = vector.shape_cast %136 : vector<1x1x128x128xbf16> to vector<128x128xbf16>
    %138 = arith.truncf %135 : vector<32x128xf32> to vector<32x128xbf16>
    %cst_75 = arith.constant dense<0.000000e+00> : vector<32x128xf32>
    %139 = tpu.matmul %138, %137, %cst_75 {dimension_numbers = #tpu.dot_dimension_numbers<[1], [0], [0], [1], [0, 0, 1, 1], [], []>} : vector<32x128xbf16>, vector<128x128xbf16>, vector<32x128xf32> -> vector<32x128xf32>
    %140 = arith.addf %132, %139 : vector<32x128xf32>
    %c0_76 = arith.constant 0 : index
    %c0_77 = arith.constant 0 : index
    %c0_78 = arith.constant 0 : index
    %141 = vector.load %arg9[%c0_76, %c0_77, %c0_78] : memref<2x1x128xf32, #tpu.memory_space<vmem>>, vector<1x1x128xf32>
    %142 = vector.shape_cast %141 : vector<1x1x128xf32> to vector<1x128xf32>
    %143 = vector.broadcast %142 : vector<1x128xf32> to vector<32x128xf32>
    %144 = arith.addf %140, %143 : vector<32x128xf32>
    %c0_79 = arith.constant 0 : index
    %c0_80 = arith.constant 0 : index
    %c0_81 = arith.constant 0 : index
    %c0_82 = arith.constant 0 : index
    %145 = vector.load %arg2[%c0_79, %c0_80, %c0_81, %c0_82] : memref<1x2x2x128xf32, #tpu.memory_space<vmem>>, vector<1x1x2x128xf32>
    %146 = vector.shape_cast %145 : vector<1x1x2x128xf32> to vector<2x128xf32>
    %147 = vector.shape_cast %146 : vector<2x128xf32> to vector<2x1x128xf32>
    %148 = vector.shape_cast %147 : vector<2x1x128xf32> to vector<2x1x128xf32>
    %149 = vector.broadcast %148 : vector<2x1x128xf32> to vector<2x16x128xf32>
    %150 = vector.shape_cast %149 : vector<2x16x128xf32> to vector<32x128xf32>
    %c0_83 = arith.constant 0 : index
    %c0_84 = arith.constant 0 : index
    %c0_85 = arith.constant 0 : index
    %c0_86 = arith.constant 0 : index
    %151 = vector.load %arg3[%c0_83, %c0_84, %c0_85, %c0_86] : memref<1x2x2x128xf32, #tpu.memory_space<vmem>>, vector<1x1x2x128xf32>
    %152 = vector.shape_cast %151 : vector<1x1x2x128xf32> to vector<2x128xf32>
    %153 = vector.shape_cast %152 : vector<2x128xf32> to vector<2x1x128xf32>
    %154 = vector.shape_cast %153 : vector<2x1x128xf32> to vector<2x1x128xf32>
    %155 = vector.broadcast %154 : vector<2x1x128xf32> to vector<2x16x128xf32>
    %156 = vector.shape_cast %155 : vector<2x16x128xf32> to vector<32x128xf32>
    %157 = arith.mulf %144, %150 : vector<32x128xf32>
    %158 = arith.addf %157, %156 : vector<32x128xf32>
    %159 = arith.addf %158, %28 : vector<32x128xf32>
    %cst_87 = arith.constant 5.000000e-01 : f32
    %160 = vector.broadcast %cst_87 : f32 to vector<32x128xf32>
    %161 = arith.mulf %160, %159 : vector<32x128xf32>
    %cst_88 = arith.constant 4.471500e-02 : f32
    %162 = vector.broadcast %cst_88 : f32 to vector<32x128xf32>
    %163 = arith.mulf %162, %159 : vector<32x128xf32>
    %164 = arith.mulf %163, %159 : vector<32x128xf32>
    %165 = arith.mulf %164, %159 : vector<32x128xf32>
    %166 = arith.addf %159, %165 : vector<32x128xf32>
    %cst_89 = arith.constant 0.797884583 : f32
    %167 = vector.broadcast %cst_89 : f32 to vector<32x128xf32>
    %168 = arith.mulf %167, %166 : vector<32x128xf32>
    %169 = math.tanh %168 : vector<32x128xf32>
    %cst_90 = arith.constant 1.000000e+00 : f32
    %170 = vector.broadcast %cst_90 : f32 to vector<32x128xf32>
    %171 = arith.addf %170, %169 : vector<32x128xf32>
    %172 = arith.mulf %161, %171 : vector<32x128xf32>
    %c2_i32_91 = arith.constant 2 : i32
    %173 = tpu.dynamic_rotate %172 by %c2_i32_91 dim 0 : vector<32x128xf32>, i32 -> vector<32x128xf32>
    %cst_92 = arith.constant 0.000000e+00 : f32
    %174 = vector.broadcast %cst_92 : f32 to vector<32x128xf32>
    %175 = arith.select %32, %173, %174 : vector<32x128xi1>, vector<32x128xf32>
    %c1_93 = arith.constant 1 : index
    %c0_94 = arith.constant 0 : index
    %c0_95 = arith.constant 0 : index
    %c0_96 = arith.constant 0 : index
    %176 = vector.load %arg6[%c1_93, %c0_94, %c0_95, %c0_96] : memref<2x5x128x128xbf16, #tpu.memory_space<vmem>>, vector<1x1x128x128xbf16>
    %177 = vector.shape_cast %176 : vector<1x1x128x128xbf16> to vector<128x128xbf16>
    %178 = arith.truncf %175 : vector<32x128xf32> to vector<32x128xbf16>
    %cst_97 = arith.constant dense<0.000000e+00> : vector<32x128xf32>
    %179 = tpu.matmul %178, %177, %cst_97 {dimension_numbers = #tpu.dot_dimension_numbers<[1], [0], [0], [1], [0, 0, 1, 1], [], []>} : vector<32x128xbf16>, vector<128x128xbf16>, vector<32x128xf32> -> vector<32x128xf32>
    %c1_i32_98 = arith.constant 1 : i32
    %180 = tpu.dynamic_rotate %172 by %c1_i32_98 dim 0 : vector<32x128xf32>, i32 -> vector<32x128xf32>
    %cst_99 = arith.constant 0.000000e+00 : f32
    %181 = vector.broadcast %cst_99 : f32 to vector<32x128xf32>
    %182 = arith.select %34, %180, %181 : vector<32x128xi1>, vector<32x128xf32>
    %c1_100 = arith.constant 1 : index
    %c1_101 = arith.constant 1 : index
    %c0_102 = arith.constant 0 : index
    %c0_103 = arith.constant 0 : index
    %183 = vector.load %arg6[%c1_100, %c1_101, %c0_102, %c0_103] : memref<2x5x128x128xbf16, #tpu.memory_space<vmem>>, vector<1x1x128x128xbf16>
    %184 = vector.shape_cast %183 : vector<1x1x128x128xbf16> to vector<128x128xbf16>
    %185 = arith.truncf %182 : vector<32x128xf32> to vector<32x128xbf16>
    %cst_104 = arith.constant dense<0.000000e+00> : vector<32x128xf32>
    %186 = tpu.matmul %185, %184, %cst_104 {dimension_numbers = #tpu.dot_dimension_numbers<[1], [0], [0], [1], [0, 0, 1, 1], [], []>} : vector<32x128xbf16>, vector<128x128xbf16>, vector<32x128xf32> -> vector<32x128xf32>
    %187 = arith.addf %179, %186 : vector<32x128xf32>
    %c1_105 = arith.constant 1 : index
    %c2_106 = arith.constant 2 : index
    %c0_107 = arith.constant 0 : index
    %c0_108 = arith.constant 0 : index
    %188 = vector.load %arg6[%c1_105, %c2_106, %c0_107, %c0_108] : memref<2x5x128x128xbf16, #tpu.memory_space<vmem>>, vector<1x1x128x128xbf16>
    %189 = vector.shape_cast %188 : vector<1x1x128x128xbf16> to vector<128x128xbf16>
    %190 = arith.truncf %172 : vector<32x128xf32> to vector<32x128xbf16>
    %cst_109 = arith.constant dense<0.000000e+00> : vector<32x128xf32>
    %191 = tpu.matmul %190, %189, %cst_109 {dimension_numbers = #tpu.dot_dimension_numbers<[1], [0], [0], [1], [0, 0, 1, 1], [], []>} : vector<32x128xbf16>, vector<128x128xbf16>, vector<32x128xf32> -> vector<32x128xf32>
    %192 = arith.addf %187, %191 : vector<32x128xf32>
    %c31_i32_110 = arith.constant 31 : i32
    %193 = tpu.dynamic_rotate %172 by %c31_i32_110 dim 0 : vector<32x128xf32>, i32 -> vector<32x128xf32>
    %cst_111 = arith.constant 0.000000e+00 : f32
    %194 = vector.broadcast %cst_111 : f32 to vector<32x128xf32>
    %195 = arith.select %36, %193, %194 : vector<32x128xi1>, vector<32x128xf32>
    %c1_112 = arith.constant 1 : index
    %c3_113 = arith.constant 3 : index
    %c0_114 = arith.constant 0 : index
    %c0_115 = arith.constant 0 : index
    %196 = vector.load %arg6[%c1_112, %c3_113, %c0_114, %c0_115] : memref<2x5x128x128xbf16, #tpu.memory_space<vmem>>, vector<1x1x128x128xbf16>
    %197 = vector.shape_cast %196 : vector<1x1x128x128xbf16> to vector<128x128xbf16>
    %198 = arith.truncf %195 : vector<32x128xf32> to vector<32x128xbf16>
    %cst_116 = arith.constant dense<0.000000e+00> : vector<32x128xf32>
    %199 = tpu.matmul %198, %197, %cst_116 {dimension_numbers = #tpu.dot_dimension_numbers<[1], [0], [0], [1], [0, 0, 1, 1], [], []>} : vector<32x128xbf16>, vector<128x128xbf16>, vector<32x128xf32> -> vector<32x128xf32>
    %200 = arith.addf %192, %199 : vector<32x128xf32>
    %c30_i32_117 = arith.constant 30 : i32
    %201 = tpu.dynamic_rotate %172 by %c30_i32_117 dim 0 : vector<32x128xf32>, i32 -> vector<32x128xf32>
    %cst_118 = arith.constant 0.000000e+00 : f32
    %202 = vector.broadcast %cst_118 : f32 to vector<32x128xf32>
    %203 = arith.select %38, %201, %202 : vector<32x128xi1>, vector<32x128xf32>
    %c1_119 = arith.constant 1 : index
    %c4_120 = arith.constant 4 : index
    %c0_121 = arith.constant 0 : index
    %c0_122 = arith.constant 0 : index
    %204 = vector.load %arg6[%c1_119, %c4_120, %c0_121, %c0_122] : memref<2x5x128x128xbf16, #tpu.memory_space<vmem>>, vector<1x1x128x128xbf16>
    %205 = vector.shape_cast %204 : vector<1x1x128x128xbf16> to vector<128x128xbf16>
    %206 = arith.truncf %203 : vector<32x128xf32> to vector<32x128xbf16>
    %cst_123 = arith.constant dense<0.000000e+00> : vector<32x128xf32>
    %207 = tpu.matmul %206, %205, %cst_123 {dimension_numbers = #tpu.dot_dimension_numbers<[1], [0], [0], [1], [0, 0, 1, 1], [], []>} : vector<32x128xbf16>, vector<128x128xbf16>, vector<32x128xf32> -> vector<32x128xf32>
    %208 = arith.addf %200, %207 : vector<32x128xf32>
    %c1_124 = arith.constant 1 : index
    %c0_125 = arith.constant 0 : index
    %c0_126 = arith.constant 0 : index
    %209 = vector.load %arg7[%c1_124, %c0_125, %c0_126] : memref<2x1x128xf32, #tpu.memory_space<vmem>>, vector<1x1x128xf32>
    %210 = vector.shape_cast %209 : vector<1x1x128xf32> to vector<1x128xf32>
    %211 = vector.broadcast %210 : vector<1x128xf32> to vector<32x128xf32>
    %212 = arith.addf %208, %211 : vector<32x128xf32>
    %cst_127 = arith.constant 5.000000e-01 : f32
    %213 = vector.broadcast %cst_127 : f32 to vector<32x128xf32>
    %214 = arith.mulf %213, %212 : vector<32x128xf32>
    %cst_128 = arith.constant 4.471500e-02 : f32
    %215 = vector.broadcast %cst_128 : f32 to vector<32x128xf32>
    %216 = arith.mulf %215, %212 : vector<32x128xf32>
    %217 = arith.mulf %216, %212 : vector<32x128xf32>
    %218 = arith.mulf %217, %212 : vector<32x128xf32>
    %219 = arith.addf %212, %218 : vector<32x128xf32>
    %cst_129 = arith.constant 0.797884583 : f32
    %220 = vector.broadcast %cst_129 : f32 to vector<32x128xf32>
    %221 = arith.mulf %220, %219 : vector<32x128xf32>
    %222 = math.tanh %221 : vector<32x128xf32>
    %cst_130 = arith.constant 1.000000e+00 : f32
    %223 = vector.broadcast %cst_130 : f32 to vector<32x128xf32>
    %224 = arith.addf %223, %222 : vector<32x128xf32>
    %225 = arith.mulf %214, %224 : vector<32x128xf32>
    %c2_i32_131 = arith.constant 2 : i32
    %226 = tpu.dynamic_rotate %225 by %c2_i32_131 dim 0 : vector<32x128xf32>, i32 -> vector<32x128xf32>
    %cst_132 = arith.constant 0.000000e+00 : f32
    %227 = vector.broadcast %cst_132 : f32 to vector<32x128xf32>
    %228 = arith.select %32, %226, %227 : vector<32x128xi1>, vector<32x128xf32>
    %c1_133 = arith.constant 1 : index
    %c0_134 = arith.constant 0 : index
    %c0_135 = arith.constant 0 : index
    %c0_136 = arith.constant 0 : index
    %229 = vector.load %arg8[%c1_133, %c0_134, %c0_135, %c0_136] : memref<2x5x128x128xbf16, #tpu.memory_space<vmem>>, vector<1x1x128x128xbf16>
    %230 = vector.shape_cast %229 : vector<1x1x128x128xbf16> to vector<128x128xbf16>
    %231 = arith.truncf %228 : vector<32x128xf32> to vector<32x128xbf16>
    %cst_137 = arith.constant dense<0.000000e+00> : vector<32x128xf32>
    %232 = tpu.matmul %231, %230, %cst_137 {dimension_numbers = #tpu.dot_dimension_numbers<[1], [0], [0], [1], [0, 0, 1, 1], [], []>} : vector<32x128xbf16>, vector<128x128xbf16>, vector<32x128xf32> -> vector<32x128xf32>
    %c1_i32_138 = arith.constant 1 : i32
    %233 = tpu.dynamic_rotate %225 by %c1_i32_138 dim 0 : vector<32x128xf32>, i32 -> vector<32x128xf32>
    %cst_139 = arith.constant 0.000000e+00 : f32
    %234 = vector.broadcast %cst_139 : f32 to vector<32x128xf32>
    %235 = arith.select %34, %233, %234 : vector<32x128xi1>, vector<32x128xf32>
    %c1_140 = arith.constant 1 : index
    %c1_141 = arith.constant 1 : index
    %c0_142 = arith.constant 0 : index
    %c0_143 = arith.constant 0 : index
    %236 = vector.load %arg8[%c1_140, %c1_141, %c0_142, %c0_143] : memref<2x5x128x128xbf16, #tpu.memory_space<vmem>>, vector<1x1x128x128xbf16>
    %237 = vector.shape_cast %236 : vector<1x1x128x128xbf16> to vector<128x128xbf16>
    %238 = arith.truncf %235 : vector<32x128xf32> to vector<32x128xbf16>
    %cst_144 = arith.constant dense<0.000000e+00> : vector<32x128xf32>
    %239 = tpu.matmul %238, %237, %cst_144 {dimension_numbers = #tpu.dot_dimension_numbers<[1], [0], [0], [1], [0, 0, 1, 1], [], []>} : vector<32x128xbf16>, vector<128x128xbf16>, vector<32x128xf32> -> vector<32x128xf32>
    %240 = arith.addf %232, %239 : vector<32x128xf32>
    %c1_145 = arith.constant 1 : index
    %c2_146 = arith.constant 2 : index
    %c0_147 = arith.constant 0 : index
    %c0_148 = arith.constant 0 : index
    %241 = vector.load %arg8[%c1_145, %c2_146, %c0_147, %c0_148] : memref<2x5x128x128xbf16, #tpu.memory_space<vmem>>, vector<1x1x128x128xbf16>
    %242 = vector.shape_cast %241 : vector<1x1x128x128xbf16> to vector<128x128xbf16>
    %243 = arith.truncf %225 : vector<32x128xf32> to vector<32x128xbf16>
    %cst_149 = arith.constant dense<0.000000e+00> : vector<32x128xf32>
    %244 = tpu.matmul %243, %242, %cst_149 {dimension_numbers = #tpu.dot_dimension_numbers<[1], [0], [0], [1], [0, 0, 1, 1], [], []>} : vector<32x128xbf16>, vector<128x128xbf16>, vector<32x128xf32> -> vector<32x128xf32>
    %245 = arith.addf %240, %244 : vector<32x128xf32>
    %c31_i32_150 = arith.constant 31 : i32
    %246 = tpu.dynamic_rotate %225 by %c31_i32_150 dim 0 : vector<32x128xf32>, i32 -> vector<32x128xf32>
    %cst_151 = arith.constant 0.000000e+00 : f32
    %247 = vector.broadcast %cst_151 : f32 to vector<32x128xf32>
    %248 = arith.select %36, %246, %247 : vector<32x128xi1>, vector<32x128xf32>
    %c1_152 = arith.constant 1 : index
    %c3_153 = arith.constant 3 : index
    %c0_154 = arith.constant 0 : index
    %c0_155 = arith.constant 0 : index
    %249 = vector.load %arg8[%c1_152, %c3_153, %c0_154, %c0_155] : memref<2x5x128x128xbf16, #tpu.memory_space<vmem>>, vector<1x1x128x128xbf16>
    %250 = vector.shape_cast %249 : vector<1x1x128x128xbf16> to vector<128x128xbf16>
    %251 = arith.truncf %248 : vector<32x128xf32> to vector<32x128xbf16>
    %cst_156 = arith.constant dense<0.000000e+00> : vector<32x128xf32>
    %252 = tpu.matmul %251, %250, %cst_156 {dimension_numbers = #tpu.dot_dimension_numbers<[1], [0], [0], [1], [0, 0, 1, 1], [], []>} : vector<32x128xbf16>, vector<128x128xbf16>, vector<32x128xf32> -> vector<32x128xf32>
    %253 = arith.addf %245, %252 : vector<32x128xf32>
    %c30_i32_157 = arith.constant 30 : i32
    %254 = tpu.dynamic_rotate %225 by %c30_i32_157 dim 0 : vector<32x128xf32>, i32 -> vector<32x128xf32>
    %cst_158 = arith.constant 0.000000e+00 : f32
    %255 = vector.broadcast %cst_158 : f32 to vector<32x128xf32>
    %256 = arith.select %38, %254, %255 : vector<32x128xi1>, vector<32x128xf32>
    %c1_159 = arith.constant 1 : index
    %c4_160 = arith.constant 4 : index
    %c0_161 = arith.constant 0 : index
    %c0_162 = arith.constant 0 : index
    %257 = vector.load %arg8[%c1_159, %c4_160, %c0_161, %c0_162] : memref<2x5x128x128xbf16, #tpu.memory_space<vmem>>, vector<1x1x128x128xbf16>
    %258 = vector.shape_cast %257 : vector<1x1x128x128xbf16> to vector<128x128xbf16>
    %259 = arith.truncf %256 : vector<32x128xf32> to vector<32x128xbf16>
    %cst_163 = arith.constant dense<0.000000e+00> : vector<32x128xf32>
    %260 = tpu.matmul %259, %258, %cst_163 {dimension_numbers = #tpu.dot_dimension_numbers<[1], [0], [0], [1], [0, 0, 1, 1], [], []>} : vector<32x128xbf16>, vector<128x128xbf16>, vector<32x128xf32> -> vector<32x128xf32>
    %261 = arith.addf %253, %260 : vector<32x128xf32>
    %c1_164 = arith.constant 1 : index
    %c0_165 = arith.constant 0 : index
    %c0_166 = arith.constant 0 : index
    %262 = vector.load %arg9[%c1_164, %c0_165, %c0_166] : memref<2x1x128xf32, #tpu.memory_space<vmem>>, vector<1x1x128xf32>
    %263 = vector.shape_cast %262 : vector<1x1x128xf32> to vector<1x128xf32>
    %264 = vector.broadcast %263 : vector<1x128xf32> to vector<32x128xf32>
    %265 = arith.addf %261, %264 : vector<32x128xf32>
    %c0_167 = arith.constant 0 : index
    %c1_168 = arith.constant 1 : index
    %c0_169 = arith.constant 0 : index
    %c0_170 = arith.constant 0 : index
    %266 = vector.load %arg2[%c0_167, %c1_168, %c0_169, %c0_170] : memref<1x2x2x128xf32, #tpu.memory_space<vmem>>, vector<1x1x2x128xf32>
    %267 = vector.shape_cast %266 : vector<1x1x2x128xf32> to vector<2x128xf32>
    %268 = vector.shape_cast %267 : vector<2x128xf32> to vector<2x1x128xf32>
    %269 = vector.shape_cast %268 : vector<2x1x128xf32> to vector<2x1x128xf32>
    %270 = vector.broadcast %269 : vector<2x1x128xf32> to vector<2x16x128xf32>
    %271 = vector.shape_cast %270 : vector<2x16x128xf32> to vector<32x128xf32>
    %c0_171 = arith.constant 0 : index
    %c1_172 = arith.constant 1 : index
    %c0_173 = arith.constant 0 : index
    %c0_174 = arith.constant 0 : index
    %272 = vector.load %arg3[%c0_171, %c1_172, %c0_173, %c0_174] : memref<1x2x2x128xf32, #tpu.memory_space<vmem>>, vector<1x1x2x128xf32>
    %273 = vector.shape_cast %272 : vector<1x1x2x128xf32> to vector<2x128xf32>
    %274 = vector.shape_cast %273 : vector<2x128xf32> to vector<2x1x128xf32>
    %275 = vector.shape_cast %274 : vector<2x1x128xf32> to vector<2x1x128xf32>
    %276 = vector.broadcast %275 : vector<2x1x128xf32> to vector<2x16x128xf32>
    %277 = vector.shape_cast %276 : vector<2x16x128xf32> to vector<32x128xf32>
    %278 = arith.mulf %265, %271 : vector<32x128xf32>
    %279 = arith.addf %278, %277 : vector<32x128xf32>
    %280 = arith.addf %279, %159 : vector<32x128xf32>
    %c0_175 = arith.constant 0 : index
    %c0_176 = arith.constant 0 : index
    %281 = vector.load %arg10[%c0_175, %c0_176] : memref<128x256xbf16, #tpu.memory_space<vmem>>, vector<128x256xbf16>
    %282 = arith.truncf %280 : vector<32x128xf32> to vector<32x128xbf16>
    %cst_177 = arith.constant dense<0.000000e+00> : vector<32x256xf32>
    %283 = tpu.matmul %282, %281, %cst_177 {dimension_numbers = #tpu.dot_dimension_numbers<[1], [0], [0], [1], [0, 0, 1, 1], [], []>} : vector<32x128xbf16>, vector<128x256xbf16>, vector<32x256xf32> -> vector<32x256xf32>
    %c0_178 = arith.constant 0 : index
    %c0_179 = arith.constant 0 : index
    %284 = vector.load %arg11[%c0_178, %c0_179] : memref<1x256xf32, #tpu.memory_space<vmem>>, vector<1x256xf32>
    %285 = vector.broadcast %284 : vector<1x256xf32> to vector<32x256xf32>
    %286 = arith.addf %283, %285 : vector<32x256xf32>
    %c0_180 = arith.constant 0 : index
    %c0_181 = arith.constant 0 : index
    %c0_182 = arith.constant 0 : index
    %287 = vector.load %arg12[%c0_180, %c0_181, %c0_182] : memref<1x32x256xf32, #tpu.memory_space<vmem>>, vector<1x32x256xf32>
    %288 = vector.shape_cast %287 : vector<1x32x256xf32> to vector<32x256xf32>
    %289 = vector.shape_cast %286 : vector<32x256xf32> to vector<1x32x256xf32>
    tpu.vector_store %arg12[%c0_180, %c0_181, %c0_182], %289 {strides = array<i32>} : memref<1x32x256xf32, #tpu.memory_space<vmem>>, vector<1x32x256xf32>,
    return
  }
  func.func @transform_0(%arg0: i32) -> (i32, i32, i32) {
    %c0_i32 = arith.constant 0 : i32
    %c0_i32_0 = arith.constant 0 : i32
    %c0_i32_1 = arith.constant 0 : i32
    return %arg0, %c0_i32, %c0_i32_0 : i32, i32, i32
  }
  func.func @transform_1(%arg0: i32) -> (i32, i32, i32, i32) {
    %c0_i32 = arith.constant 0 : i32
    %c0_i32_0 = arith.constant 0 : i32
    %c0_i32_1 = arith.constant 0 : i32
    %c0_i32_2 = arith.constant 0 : i32
    return %arg0, %c0_i32, %c0_i32_0, %c0_i32_1 : i32, i32, i32, i32
  }
  func.func @transform_2(%arg0: i32) -> (i32, i32, i32, i32) {
    %c0_i32 = arith.constant 0 : i32
    %c0_i32_0 = arith.constant 0 : i32
    %c0_i32_1 = arith.constant 0 : i32
    %c0_i32_2 = arith.constant 0 : i32
    return %arg0, %c0_i32, %c0_i32_0, %c0_i32_1 : i32, i32, i32, i32
  }
  func.func @transform_3(%arg0: i32) -> (i32, i32) {
    %c0_i32 = arith.constant 0 : i32
    %c0_i32_0 = arith.constant 0 : i32
    %c0_i32_1 = arith.constant 0 : i32
    return %c0_i32, %c0_i32_0 : i32, i32
  }
  func.func @transform_4(%arg0: i32) -> (i32, i32) {
    %c0_i32 = arith.constant 0 : i32
    %c0_i32_0 = arith.constant 0 : i32
    %c0_i32_1 = arith.constant 0 : i32
    return %c0_i32, %c0_i32_0 : i32, i32
  }
  func.func @transform_5(%arg0: i32) -> (i32, i32, i32, i32) {
    %c0_i32 = arith.constant 0 : i32
    %c0_i32_0 = arith.constant 0 : i32
    %c0_i32_1 = arith.constant 0 : i32
    %c0_i32_2 = arith.constant 0 : i32
    %c0_i32_3 = arith.constant 0 : i32
    return %c0_i32, %c0_i32_0, %c0_i32_1, %c0_i32_2 : i32, i32, i32, i32
  }
  func.func @transform_6(%arg0: i32) -> (i32, i32, i32) {
    %c0_i32 = arith.constant 0 : i32
    %c0_i32_0 = arith.constant 0 : i32
    %c0_i32_1 = arith.constant 0 : i32
    %c0_i32_2 = arith.constant 0 : i32
    return %c0_i32, %c0_i32_0, %c0_i32_1 : i32, i32, i32
  }
  func.func @transform_7(%arg0: i32) -> (i32, i32, i32, i32) {
    %c0_i32 = arith.constant 0 : i32
    %c0_i32_0 = arith.constant 0 : i32
    %c0_i32_1 = arith.constant 0 : i32
    %c0_i32_2 = arith.constant 0 : i32
    %c0_i32_3 = arith.constant 0 : i32
    return %c0_i32, %c0_i32_0, %c0_i32_1, %c0_i32_2 : i32, i32, i32, i32
  }
  func.func @transform_8(%arg0: i32) -> (i32, i32, i32) {
    %c0_i32 = arith.constant 0 : i32
    %c0_i32_0 = arith.constant 0 : i32
    %c0_i32_1 = arith.constant 0 : i32
    %c0_i32_2 = arith.constant 0 : i32
    return %c0_i32, %c0_i32_0, %c0_i32_1 : i32, i32, i32
  }
  func.func @transform_9(%arg0: i32) -> (i32, i32) {
    %c0_i32 = arith.constant 0 : i32
    %c0_i32_0 = arith.constant 0 : i32
    %c0_i32_1 = arith.constant 0 : i32
    return %c0_i32, %c0_i32_0 : i32, i32
  }
  func.func @transform_10(%arg0: i32) -> (i32, i32) {
    %c0_i32 = arith.constant 0 : i32
    %c0_i32_0 = arith.constant 0 : i32
    %c0_i32_1 = arith.constant 0 : i32
    return %c0_i32, %c0_i32_0 : i32, i32
  }
  func.func @transform_11(%arg0: i32) -> (i32, i32, i32) {
    %c0_i32 = arith.constant 0 : i32
    %c0_i32_0 = arith.constant 0 : i32
    %c0_i32_1 = arith.constant 0 : i32
    return %arg0, %c0_i32, %c0_i32_0 : i32, i32, i32
  }
}

</mosaic_0001>

<bundles_post_ra>
// kernel: tpu_custom_call.1
= control target key start
LH: loop header
LB: loop body
LE: loop exit
PB: predicated region body
PF: predicated region fallthrough
CT: control target
= control target key end

     0   :  { %16 = vsyncpa [#allocation3], 0  ;;  %s5381_s0 = inlined_call_operand.vmem [shape: f32[1,32,4], index: 0, kind: input, shape index: {}]   ;;  %s5382_s1 = inlined_call_operand.vmem [shape: f32[1,2,2,128], index: 1, kind: input, shape index: {}]   ;;  %s5383_s2 = inlined_call_operand.vmem [shape: f32[1,2,2,128], index: 2, kind: input, shape index: {}]   ;;  %s5384_s3 = inlined_call_operand.vmem [shape: f32[4,128], index: 3, kind: input, shape index: {}]   ;;  %s5385_s4 = inlined_call_operand.vmem [shape: f32[1,128], index: 4, kind: input, shape index: {}]   ;;  %s5386_s5 = inlined_call_operand.hbm [shape: bf16[2,5,128,128], index: 5, kind: input, shape index: {}]   ;;  %s5387_s6 = inlined_call_operand.vmem [shape: f32[2,1,128], index: 6, kind: input, shape index: {}]   ;;  %s5388_s7 = inlined_call_operand.hbm [shape: bf16[2,5,128,128], index: 7, kind: input, shape index: {}]   ;;  %s5389_s8 = inlined_call_operand.vmem [shape: f32[2,1,128], index: 8, kind: input, shape index: {}]   ;;  %s5390_s9 = inlined_call_operand.hbm [shape: bf16[128,256], index: 9, kind: input, shape index: {}]   ;;  %s5391_s10 = inlined_call_operand.vmem [shape: f32[1,256], index: 10, kind: input, shape index: {}]   ;;  %s5392_s11 = inlined_call_operand.hbm [shape: f32[1,32,256], index: 11, kind: output, shape index: {}]  }
   0x1   :  { %17 = vsyncpa [#allocation6], 0 }
   0x2   :  { %18 = vsyncpa [#allocation4], 0  ;;  %s4606_s17 = smov [#allocation5]   ;;  %s4607_s19 = smov [#allocation2]  }
   0x3   :  { %s48_s18 = sshll.u32 %s4606_s17, 4  ;;  %s34_s20 = sshll.u32 %s4607_s19, 4  ;;  %s49_s18 = int_to_ptr.vmem [resolvable:$true] %s48_s18  ;;  %s4682_s20 = int_to_ptr.vmem [resolvable:$true] %s34_s20 }
   0x4   :  { %s4512_s23 = scalar_lea.hbm %s5388_s7, 10240 }
   0x5   :  { %p4513_p0 = scmp.ne.s32.totalorder %s5388_s7, %s4512_s23  ;;  %p4516_p1 = scmp.lt.u32.totalorder %s4512_s23, %s5388_s7 }
   0x7   :  { %p4518_p2 = pnand %p4516_p1, %p4513_p0 }
   0x9   :  { %4521 = shalt.err (!%p4518_p2)
}
   0xa   :  { %s4522_s28 = scalar_lea.vmem %s49_s18, 10240  ;;  %p4527_p4 = scmp.lt.s32.totalorder %s49_s18, %s49_s18 }
   0xb   :  { %p4523_p3 = scmp.ne.s32.totalorder %s49_s18, %s4522_s28  ;;  %p4528_p5 = scmp.lt.s32.totalorder %s4522_s28, %s4522_s28 }
   0xd   :  { %p4529_p6 = por %p4528_p5, %p4527_p4 }
   0xf   :  { %p4530_p7 = pnand %p4529_p6, %p4523_p3 }
  0x11   :  { %4533 = shalt.err (!%p4530_p7)
}
  0x12   :  { %s4608_s29 = smov 64   ;;  %s4609_s30 = smov 4  }
  0x13   :  { %54 = dma.hbm_to_vmem [thread:$0]  %s5388_s7, 10240, %s49_s18, [#allocation6], %s4608_s29, %s4608_s29, %s4609_s30  }
  0x14   :  { %s4534_s16 = scalar_lea.hbm %s5386_s5, 10240 }
  0x15   :  { %p4535_p8 = scmp.ne.s32.totalorder %s5386_s5, %s4534_s16  ;;  %p4538_p9 = scmp.lt.u32.totalorder %s4534_s16, %s5386_s5 }
  0x17   :  { %p4540_p10 = pnand %p4538_p9, %p4535_p8 }
  0x19   :  { %4543 = shalt.err (!%p4540_p10)
}
  0x1a   :  { %s4544_s23 = scalar_lea.vmem %s4682_s20, 10240  ;;  %p4549_p12 = scmp.lt.s32.totalorder %s4682_s20, %s4682_s20 }
  0x1b   :  { %p4545_p11 = scmp.ne.s32.totalorder %s4682_s20, %s4544_s23  ;;  %p4550_p13 = scmp.lt.s32.totalorder %s4544_s23, %s4544_s23 }
  0x1d   :  { %p4551_p0 = por %p4550_p13, %p4549_p12 }
  0x1f   :  { %p4552_p1 = pnand %p4551_p0, %p4545_p11 }
  0x21   :  { %4555 = shalt.err (!%p4552_p1)
}
  0x22   :  { %40 = dma.hbm_to_vmem [thread:$0]  %s5386_s5, 10240, %s4682_s20, [#allocation3], %s4608_s29, %s4608_s29, %s4609_s30  }
  0x23   :  { %s4610_s24 = smov [#allocation7]   ;;  %s4556_s28 = scalar_lea.hbm %s5390_s9, 2048 }
  0x24   :  { %s62_s25 = sshll.u32 %s4610_s24, 4  ;;  %p4557_p2 = scmp.ne.s32.totalorder %s5390_s9, %s4556_s28  ;;  %s63_s25 = int_to_ptr.vmem [resolvable:$true] %s62_s25 }
  0x25   :  { %p4560_p3 = scmp.lt.u32.totalorder %s4556_s28, %s5390_s9 }
  0x27   :  { %p4562_p4 = pnand %p4560_p3, %p4557_p2 }
  0x29   :  { %4565 = shalt.err (!%p4562_p4)
}
  0x2a   :  { %s4566_s16 = scalar_lea.vmem %s63_s25, 2048  ;;  %p4571_p6 = scmp.lt.s32.totalorder %s63_s25, %s63_s25 }
  0x2b   :  { %p4567_p5 = scmp.ne.s32.totalorder %s63_s25, %s4566_s16  ;;  %p4572_p7 = scmp.lt.s32.totalorder %s4566_s16, %s4566_s16 }
  0x2d   :  { %p4573_p8 = por %p4572_p7, %p4571_p6 }
  0x2f   :  { %p4574_p9 = pnand %p4573_p8, %p4567_p5 }
  0x31   :  { %4577 = shalt.err (!%p4574_p9)
}
  0x32   :  { %s4611_s5 = smov 128   ;;  %s4612_s20 = smov 8  }
  0x33   :  { %68 = dma.hbm_to_vmem [thread:$0]  %s5390_s9, 2048, %s63_s25, [#allocation6], %s4611_s5, %s4611_s5, %s4612_s20  }
  0x34   :  { %4600 = dma.done.wait [#allocation3], 10240  }
  0x35   :  { %4601 = vsyncadd [#allocation3], 4294957056 }
  0x36   :  { %4602 = dma.done.wait [#allocation6], 12288  }
  0x37   :  { %4603 = vsyncadd [#allocation6], 4294955008  ;;  %v4613_v0 = vmov 0   ;;  %v84_v1 = vld [vmem:[%s5381_s0 + $0x18] sm:$0xff]  ;;  %v81_v2 = vld [vmem:[%s5381_s0] sm:$0xff]  ;;  %v4614_v5 = vmov 1   ;;  %v106_v25 = vlaneseq }
  0x38   :  { %4289 = vset.pattern.permute.xlu1 %v4613_v0  ;;  %4288 = vset.pattern.permute.xlu0 %v4613_v0  ;;  %v83_v3 = vld [vmem:[%s5381_s0 + $0x10] sm:$0xff]  ;;  %v82_v4 = vld [vmem:[%s5381_s0 + $0x8] sm:$0xff]  ;;  %v4615_v6 = vmov 2   ;;  %v4616_v7 = vmov 3   ;;  %v4296_v8 = vld [vmem:[#allocation2] sm:$0xff]   ;;  %vm4617_vm5 = vmmov 1  }
  0x39   :  { %103 = vperm.xlu1 %4289, %v84_v1   ;;  %88 = vperm.xlu0 %4288, %v81_v2   ;;  %v4297_v9 = vld [vmem:[#allocation2 + $0x40] sm:$0xff]   ;;  %v4298_v10 = vld [vmem:[#allocation2 + $0x8] sm:$0xff]   ;;  %v4300_v12 = vld [vmem:[#allocation2 + $0x10] sm:$0xff]   ;;  %v4742_v28 = vshrl.u32 %v106_v25, 7 }
  0x3a   :  { %3828 = vmatprep.subr.bf16.mxu0 %v4296_v8  ;;  %3808 = vmatprep.subr.bf16.mxu1 %v4297_v9  ;;  %v4299_v11 = vld [vmem:[#allocation2 + $0x48] sm:$0xff]   ;;  %v4301_v13 = vld [vmem:[#allocation2 + $0x50] sm:$0xff]   ;;  %v4302_v14 = vld [vmem:[#allocation2 + $0x18] sm:$0xff]  }
  0x3b   :  { %3829 = vmatpush3.bf16.msra.mxu0 %v4296_v8  ;;  %3809 = vmatpush3.bf16.msra.mxu1 %v4297_v9  ;;  %v4303_v15 = vld [vmem:[#allocation2 + $0x58] sm:$0xff]   ;;  %v4304_v16 = vld [vmem:[#allocation2 + $0x20] sm:$0xff]   ;;  %v4306_v18 = vld [vmem:[#allocation2 + $0x28] sm:$0xff]   ;;  %v4745_v31 = vsub.s32 0, %v4742_v28  ;;  %v143_v36 = vsub.s32 1, %v4742_v28  ;;  %v171_v37 = vsub.s32 2, %v4742_v28 }
  0x3c   :  { %3830 = vmatprep.subr.bf16.mxu0 %v4298_v10  ;;  %3810 = vmatprep.subr.bf16.mxu1 %v4299_v11  ;;  %v4305_v17 = vld [vmem:[#allocation2 + $0x60] sm:$0xff]   ;;  %v4307_v19 = vld [vmem:[#allocation2 + $0x68] sm:$0xff]   ;;  %v4308_v20 = vld [vmem:[#allocation2 + $0x30] sm:$0xff]   ;;  %v199_v43 = vsub.s32 3, %v4742_v28  ;;  %vm214_vm0 = vcmp.ge.s32.totalorder %v4742_v28, 1  ;;  %vm291_vm1 = vcmp.lt.s32.totalorder %v4742_v28, 1 }
  0x3d   :  { %98 = vperm.xlu1 %4289, %v83_v3   ;;  %93 = vperm.xlu0 %4288, %v82_v4   ;;  %v4309_v21 = vld [vmem:[#allocation2 + $0x70] sm:$0xff]   ;;  %v4310_v22 = vld [vmem:[#allocation2 + $0x38] sm:$0xff]   ;;  %v4739_v24 = vld [vmem:[#allocation2 + $0x80] sm:$0xff]   ;;  %vm770_vm2 = vcmp.lt.s32.totalorder %v4742_v28, 6  ;;  %vm260_vm3 = vcmp.lt.s32.totalorder %v4742_v28, 2  ;;  %vm212_vm4 = vcmp.ge.s32.totalorder %v4742_v28, 2 }
  0x3e   :  { %v4311_v23 = vld [vmem:[#allocation2 + $0x78] sm:$0xff]   ;;  %v85_v32 = vld [vmem:[%s5384_s3] sm:$0xf]  ;;  %vm4822_vm6 = vmpackc.low %vm4617_vm5, %vm214_vm0  ;;  %vm637_vm8 = vcmp.lt.s32.totalorder %v4742_v28, 7 }
  0x3f   :  { %3831 = vmatpush3.bf16.msra.mxu0 %v4298_v10  ;;  %3811 = vmatpush3.bf16.msra.mxu1 %v4299_v11  ;;  %v109_v35 = vrot.slane %v85_v32, %v4745_v31  ;;  %v144_v41 = vrot.slane %v85_v32, %v143_v36  ;;  %v172_v42 = vrot.slane %v85_v32, %v171_v37  ;;  %v3323_v44 = vld [vmem:[%s5385_s4] ss:$0 sm:$0xff]  ;;  %vm4842_vm7 = vmpackc.low %vm4617_vm5, %vm212_vm4 }
  0x40   :  { %3832 = vmatprep.subr.bf16.mxu0 %v4300_v12  ;;  %3812 = vmatprep.subr.bf16.mxu1 %v4301_v13  ;;  %v200_v50 = vrot.slane %v85_v32, %v199_v43 }
  0x41   :  { %4291 = vset.pattern.permute.xlu1 %v4614_v5  ;;  %4290 = vset.pattern.permute.xlu0 %v4614_v5 }
  0x42   :  { %130 = vperm.xlu1 %4291, %v82_v4   ;;  %126 = vperm.xlu0 %4290, %v81_v2  }
  0x43   :  { %3833 = vmatpush3.bf16.msra.mxu0 %v4300_v12  ;;  %3813 = vmatpush3.bf16.msra.mxu1 %v4301_v13 }
  0x44   :  { %3834 = vmatprep.subr.bf16.mxu0 %v4302_v14  ;;  %3814 = vmatprep.subr.bf16.mxu1 %v4303_v15 }
  0x46   :  { %138 = vperm.xlu1 %4291, %v84_v1   ;;  %134 = vperm.xlu0 %4290, %v83_v3  }
  0x47   :  { %3835 = vmatpush3.bf16.msra.mxu0 %v4302_v14  ;;  %3815 = vmatpush3.bf16.msra.mxu1 %v4303_v15 }
  0x48   :  { %3836 = vmatprep.subr.bf16.mxu0 %v4304_v16  ;;  %3816 = vmatprep.subr.bf16.mxu1 %v4305_v17 }
  0x4a   :  { %4292 = vset.pattern.permute.xlu1 %v4615_v6  ;;  %4293 = vset.pattern.permute.xlu0 %v4615_v6 }
  0x4b   :  { %154 = vperm.xlu1 %4292, %v81_v2   ;;  %158 = vperm.xlu0 %4293, %v82_v4  }
  0x4c   :  { %3837 = vmatpush3.bf16.msra.mxu0 %v4304_v16  ;;  %3817 = vmatpush3.bf16.msra.mxu1 %v4305_v17 }
  0x4d   :  { %3838 = vmatprep.subr.bf16.mxu0 %v4306_v18  ;;  %3818 = vmatprep.subr.bf16.mxu1 %v4307_v19 }
  0x4f   :  { %166 = vperm.xlu1 %4292, %v84_v1   ;;  %4294 = vset.pattern.permute.xlu0 %v4616_v7 }
  0x50   :  { %182 = vperm.xlu0 %4294, %v81_v2   ;;  %3839 = vmatpush3.bf16.msra.mxu0 %v4306_v18 }
  0x51   :  { %3819 = vmatpush3.bf16.msra.mxu1 %v4307_v19  ;;  %3840 = vmatprep.subr.bf16.mxu0 %v4308_v20 }
  0x52   :  { %3820 = vmatprep.subr.bf16.mxu1 %v4309_v21 }
  0x53   :  { %162 = vperm.xlu1 %4292, %v83_v3  }
  0x54   :  { %190 = vperm.xlu0 %4294, %v83_v3   ;;  %3841 = vmatpush3.bf16.msra.mxu0 %v4308_v20 }
  0x55   :  { %3821 = vmatpush3.bf16.msra.mxu1 %v4309_v21  ;;  %3842 = vmatprep.subr.bf16.mxu0 %v4310_v22 }
  0x56   :  { %3822 = vmatprep.subr.bf16.mxu1 %v4311_v23 }
  0x57   :  { %4295 = vset.pattern.permute.xlu1 %v4616_v7 }
  0x58   :  { %186 = vperm.xlu1 %4295, %v82_v4   ;;  %3843 = vmatpush3.bf16.msra.mxu0 %v4310_v22 }
  0x59   :  { %3823 = vmatpush3.bf16.msra.mxu1 %v4311_v23  ;;  %3848 = vmatprep.subr.bf16.mxu0 %v4739_v24 }
  0x5c   :  { %194 = vperm.xlu1 %4295, %v84_v1  }
  0xb8   :  { %v104_v26 = vpop.permute.xlu1 %103  ;;  %v89_v27 = vpop.permute.xlu0 %88 }
  0xb9   :  { %v110_v40 = vmul.f32 %v109_v35, %v89_v27  ;;  %v113_v1 = vmul.f32 %v109_v35, %v104_v26 }
  0xbb   :  { %v121_v45 = vadd.f32 %v3323_v44, %v110_v40  ;;  %v124_v12 = vadd.f32 %v3323_v44, %v113_v1 }
  0xbc   :  { %v99_v29 = vpop.permute.xlu1 %98  ;;  %v94_v30 = vpop.permute.xlu0 %93 }
  0xbd   :  { %v112_v51 = vmul.f32 %v109_v35, %v99_v29  ;;  %v111_v52 = vmul.f32 %v109_v35, %v94_v30 }
  0xbf   :  { %v123_v59 = vadd.f32 %v3323_v44, %v112_v51  ;;  %v122_v60 = vadd.f32 %v3323_v44, %v111_v52 }
  0xc1   :  { %v131_v33 = vpop.permute.xlu1 %130  ;;  %v127_v34 = vpop.permute.xlu0 %126 }
  0xc2   :  { %v145_v46 = vmul.f32 %v144_v41, %v127_v34  ;;  %v146_v61 = vmul.f32 %v144_v41, %v131_v33 }
  0xc4   :  { %v149_v53 = vadd.f32 %v145_v46, %v121_v45  ;;  %v150_v9 = vadd.f32 %v146_v61, %v122_v60 }
  0xc5   :  { %v139_v38 = vpop.permute.xlu1 %138  ;;  %v135_v39 = vpop.permute.xlu0 %134 }
  0xc6   :  { %v147_v55 = vmul.f32 %v144_v41, %v135_v39  ;;  %v148_v10 = vmul.f32 %v144_v41, %v139_v38 }
  0xc8   :  { %v151_v2 = vadd.f32 %v147_v55, %v123_v59  ;;  %v152_v20 = vadd.f32 %v148_v10, %v124_v12 }
  0xca   :  { %v155_v47 = vpop.permute.xlu1 %154  ;;  %v159_v48 = vpop.permute.xlu0 %158 }
  0xcb   :  { %v173_v49 = vmul.f32 %v172_v42, %v155_v47  ;;  %v174_v5 = vmul.f32 %v172_v42, %v159_v48 }
  0xcd   :  { %v177_v57 = vadd.f32 %v173_v49, %v149_v53  ;;  %v178_v15 = vadd.f32 %v174_v5, %v150_v9 }
  0xce   :  { %v167_v54 = vpop.permute.xlu1 %166 }
  0xcf   :  { %v183_v56 = vpop.permute.xlu0 %182  ;;  %v176_v16 = vmul.f32 %v172_v42, %v167_v54 }
  0xd0   :  { %v201_v58 = vmul.f32 %v200_v50, %v183_v56 }
  0xd1   :  { %v180_v26 = vadd.f32 %v176_v16, %v152_v20 }
  0xd2   :  { %v4759_v62 = vadd.f32 %v201_v58, %v177_v57  ;;  %v163_v63 = vpop.permute.xlu1 %162 }
  0xd3   :  { %v175_v3 = vmul.f32 %v172_v42, %v163_v63  ;;  %v191_v4 = vpop.permute.xlu0 %190 }
  0xd4   :  { %v224_v6 = vmul.f32 0.044715, %v4759_v62  ;;  %v203_v7 = vmul.f32 %v200_v50, %v191_v4  ;;  %v220_v52 = vmul.f32 0.5, %v4759_v62 }
  0xd5   :  { %v179_v8 = vadd.f32 %v175_v3, %v151_v2 }
  0xd6   :  { %v228_v11 = vmul.f32 %v224_v6, %v4759_v62 }
  0xd7   :  { %v4763_v13 = vadd.f32 %v203_v7, %v179_v8  ;;  %v187_v14 = vpop.permute.xlu1 %186 }
  0xd8   :  { %v232_v17 = vmul.f32 %v228_v11, %v4759_v62  ;;  %v202_v18 = vmul.f32 %v200_v50, %v187_v14 }
  0xd9   :  { %v226_v19 = vmul.f32 0.044715, %v4763_v13  ;;  %v222_v51 = vmul.f32 0.5, %v4763_v13 }
  0xda   :  { %v236_v21 = vadd.f32 %v232_v17, %v4759_v62  ;;  %v4768_v22 = vadd.f32 %v202_v18, %v178_v15 }
  0xdb   :  { %v230_v23 = vmul.f32 %v226_v19, %v4763_v13  ;;  %v195_v25 = vpop.permute.xlu1 %194 }
  0xdc   :  { %v225_v27 = vmul.f32 0.044715, %v4768_v22  ;;  %v204_v29 = vmul.f32 %v200_v50, %v195_v25  ;;  %v240_v32 = vmul.f32 0.7978846, %v236_v21  ;;  %v221_v53 = vmul.f32 0.5, %v4768_v22 }
  0xdd   :  { %v234_v30 = vmul.f32 %v230_v23, %v4763_v13  ;;  %v4438_v23 = vld [vmem:[#allocation5 + $0x1f0] sm:$0xff]  }
  0xde   :  { %v229_v33 = vmul.f32 %v225_v27, %v4768_v22  ;;  %v4774_v34 = vadd.f32 %v204_v29, %v180_v26  ;;  %4480 = vtanh.f32 %v240_v32 }
  0xdf   :  { %v238_v35 = vadd.f32 %v234_v30, %v4763_v13 }
  0xe0   :  { %v233_v37 = vmul.f32 %v229_v33, %v4768_v22  ;;  %v227_v38 = vmul.f32 0.044715, %v4774_v34  ;;  %v223_v59 = vmul.f32 0.5, %v4774_v34  ;;  %v4313_v33 = vld [vmem:[#allocation2 + $0x88] sm:$0xff]  }
  0xe1   :  { %v242_v39 = vmul.f32 0.7978846, %v238_v35 }
  0xe2   :  { %v237_v40 = vadd.f32 %v233_v37, %v4768_v22  ;;  %v231_v41 = vmul.f32 %v227_v38, %v4774_v34 }
  0xe3   :  { %4482 = vtanh.f32 %v242_v39 }
  0xe4   :  { %v241_v42 = vmul.f32 0.7978846, %v237_v40  ;;  %v235_v43 = vmul.f32 %v231_v41, %v4774_v34  ;;  %v4314_v41 = vld [vmem:[#allocation2 + $0x90] sm:$0xff]  }
  0xe6   :  { %4484 = vtanh.f32 %v241_v42  ;;  %v239_v44 = vadd.f32 %v235_v43, %v4774_v34  ;;  %v4315_v42 = vld [vmem:[#allocation2 + $0x98] sm:$0xff]   ;;  %v4316_v43 = vld [vmem:[#allocation2 + $0xa0] sm:$0xff]  }
  0xe8   :  { %v243_v45 = vmul.f32 0.7978846, %v239_v44  ;;  %v4481_v46 = vpop.eup %4480  ;;  %v4317_v44 = vld [vmem:[#allocation2 + $0xa8] sm:$0xff]  }
  0xe9   :  { %v248_v49 = vadd.f32 1.0, %v4481_v46  ;;  %v4319_v46 = vld [vmem:[#allocation2 + $0xb8] sm:$0xff]  }
  0xea   :  { %4486 = vtanh.f32 %v243_v45  ;;  %v4318_v45 = vld [vmem:[#allocation2 + $0xb0] sm:$0xff]  }
  0xeb   :  { %v4788_v56 = vmul.f32 %v248_v49, %v220_v52 }
  0xed   :  { %v4483_v47 = vpop.eup %4482  ;;  %v287_v4 = vrot.slane %v4788_v56, 7  ;;  %v256_v5 = vrot.slane %v4788_v56, 6  ;;  %v766_v8 = vrot.slane %v4788_v56, 2  ;;  %v633_v49 = vrot.slane %v4788_v56, 1 }
  0xee   :  { %v250_v48 = vadd.f32 1.0, %v4483_v47 }
  0xf0   :  { %v4485_v50 = vpop.eup %4484  ;;  %v4786_v55 = vmul.f32 %v250_v48, %v222_v51  ;;  %v4320_v48 = vld [vmem:[#allocation2 + $0xc0] sm:$0xff]  }
  0xf1   :  { %v249_v54 = vadd.f32 1.0, %v4485_v50 }
  0xf2   :  { %v768_v2 = vrot.slane %v4786_v55, 2  ;;  %v289_v6 = vrot.slane %v4786_v55, 7  ;;  %v258_v7 = vrot.slane %v4786_v55, 6  ;;  %v635_v50 = vrot.slane %v4786_v55, 1 }
  0xf3   :  { %v4790_v57 = vmul.f32 %v249_v54, %v221_v53  ;;  %v4454_v54 = vld [vmem:[#allocation5 + $0x270] sm:$0xff]  }
  0xf4   :  { %v4487_v58 = vpop.eup %4486 }
  0xf5   :  { %v251_v60 = vadd.f32 1.0, %v4487_v58  ;;  %v288_v61 = vrot.slane %v4790_v57, 7  ;;  %v257_v63 = vrot.slane %v4790_v57, 6  ;;  %v767_v1 = vrot.slane %v4790_v57, 2  ;;  %v4322_v58 = vld [vmem:[#allocation2 + $0xd0] sm:$0xff]  }
  0xf6   :  { %v530_v38 = vpack.c.bf16 %v4790_v57, %v4788_v56  ;;  %v634_v47 = vrot.slane %v4790_v57, 1  ;;  %v4321_v56 = vld [vmem:[#allocation2 + $0xc8] sm:$0xff]  }
  0xf7   :  { %v4801_v3 = vmul.f32 %v251_v60, %v223_v59  ;;  %v4811_v9 = vsel %vm770_vm2, %v767_v1, %v768_v2  ;;  %v294_v11 = vsel %vm291_vm1, %v287_v4, %v288_v61  ;;  %v263_v14 = vsel %vm260_vm3, %v256_v5, %v257_v63  ;;  %v4323_v59 = vld [vmem:[#allocation2 + $0xd8] sm:$0xff]   ;;  %v4325_v60 = vld [vmem:[#allocation2 + $0xe8] sm:$0xff]  }
  0xf8   :  { %v293_v16 = vsel %vm291_vm1, %v288_v61, %v289_v6  ;;  %v262_v17 = vsel %vm260_vm3, %v257_v63, %v258_v7  ;;  %v4832_v18 = vsel %vm770_vm2, %v766_v8, %v767_v1  ;;  %v639_v51 = vsel %vm637_vm8, %v634_v47, %v635_v50  ;;  %v4326_v61 = vld [vmem:[#allocation2 + $0xf0] sm:$0xff]   ;;  %v4327_v63 = vld [vmem:[#allocation2 + $0xf8] sm:$0xff]  }
  0xf9   :  { %v290_v10 = vrot.slane %v4801_v3, 7  ;;  %v259_v12 = vrot.slane %v4801_v3, 6  ;;  %v769_v19 = vrot.slane %v4801_v3, 2  ;;  %v3383_v35 = vpack.c.bf16 %v4811_v9, %v4832_v18  ;;  %v4335_v9 = vld [vmem:[#allocation2 + $0x138] sm:$0xff]   ;;  %v4338_v18 = vld [vmem:[#allocation5 + $0x50] sm:$0xff]  }
  0xfa   :  { %v640_v52 = vsel %vm637_vm8, %v633_v49, %v634_v47  ;;  %v531_v53 = vpack.c.bf16 %v4801_v3, %v4786_v55  ;;  %v4324_v55 = vld [vmem:[#allocation2 + $0xe0] sm:$0xff]   ;;  %v636_v1 = vrot.slane %v4801_v3, 1  ;;  %v4330_v3 = vld [vmem:[#allocation2 + $0x110] sm:$0xff]  }
  0xfb   :  { %v295_v20 = vsel %vm291_vm1, %v290_v10, %v287_v4  ;;  %v264_v21 = vsel %vm260_vm3, %v259_v12, %v256_v5  ;;  %v292_v25 = vsel %vm291_vm1, %v289_v6, %v290_v10  ;;  %v261_v26 = vsel %vm260_vm3, %v258_v7, %v259_v12  ;;  %v4331_v10 = vld [vmem:[#allocation2 + $0x118] sm:$0xff]   ;;  %v4333_v12 = vld [vmem:[#allocation2 + $0x128] sm:$0xff]  }
  0xfc   :  { %v3333_v27 = vpack.c.bf16 %v294_v11, %v295_v20  ;;  %v3347_v29 = vpack.c.bf16 %v263_v14, %v264_v21  ;;  %v3336_v30 = vpack.c.bf16 %v292_v25, %v293_v16  ;;  %v3350_v32 = vpack.c.bf16 %v261_v26, %v262_v17  ;;  %v4332_v11 = vld [vmem:[#allocation2 + $0x120] sm:$0xff]   ;;  %v4334_v14 = vld [vmem:[#allocation2 + $0x130] sm:$0xff]   ;;  %v4337_v17 = vld [vmem:[#allocation5 + $0x48] sm:$0xff]  }
  0xfd   :  { %v4854_v37 = vsel %vm770_vm2, %v768_v2, %v769_v19  ;;  %v4864_v39 = vsel %vm770_vm2, %v769_v19, %v766_v8  ;;  %v3369_v57 = vpack.c.bf16 %v639_v51, %v640_v52  ;;  %v4328_v2 = vld [vmem:[#allocation2 + $0x100] sm:$0xff]   ;;  %v638_v4 = vsel %vm637_vm8, %v635_v50, %v636_v1  ;;  %v4329_v8 = vld [vmem:[#allocation2 + $0x108] sm:$0xff]   ;;  %v4339_v19 = vld [vmem:[#allocation5 + $0x58] sm:$0xff]  }
  0xfe   :  { %3824 = vmatprep.mubr.msk.bf16.mxu1 %vm4822_vm6, %v3333_v27  ;;  %3844 = vmatprep.mubr.msk.bf16.mxu0 %vm4842_vm7, %v3347_v29  ;;  %v3386_v40 = vpack.c.bf16 %v4864_v39, %v4854_v37  ;;  %v641_v5 = vsel %vm637_vm8, %v636_v1, %v633_v49  ;;  %v4336_v16 = vld [vmem:[#allocation5 + $0x40] sm:$0xff]   ;;  %v4341_v21 = vld [vmem:[#allocation5 + $0x68] sm:$0xff]   ;;  %v4342_v25 = vld [vmem:[#allocation5 + $0x70] sm:$0xff]  }
  0xff   :  { %3825 = vmatmul.mubr.msk.bf16.vlgmr.msra.gmra.mrb[0].mxu1 %vm4822_vm6, %v3336_v30  ;;  %3845 = vmatmul.mubr.msk.bf16.vlgmr.msra.gmra.mrb[0].mxu0 %vm4842_vm7, %v3350_v32  ;;  %v3372_v6 = vpack.c.bf16 %v641_v5, %v638_v4  ;;  %v4340_v20 = vld [vmem:[#allocation5 + $0x60] sm:$0xff]   ;;  %v4343_v27 = vld [vmem:[#allocation5 + $0x78] sm:$0xff]   ;;  %v3388_v37 = vld [vmem:[%s5387_s6] ss:$0 sm:$0xff] }
 0x100   :  { %3849 = vmatpush3.bf16.msra.mxu0 %v4739_v24  ;;  %3864 = vmatprep.mubr.bf16.mxu0 %v530_v38  ;;  %v211_v24 = vadd.s32 8, %v4742_v28  ;;  %v3591_v7 = vld.sshfl [vmem:[%s5383_s2 + $0x2] sm:$0x11 pattern:$0x75316420] }
 0x101   :  { %3850 = vmatprep.subr.bf16.mxu0 %v4313_v33  ;;  %3908 = vmatprep.subr.bf16.mxu1 %v4336_v16 }
 0x102   :  { %vm217_vm9 = vcmp.lt.s32.totalorder %v211_v24, 15  ;;  %vm219_vm11 = vcmp.lt.s32.totalorder %v211_v24, 14  ;;  %3909 = vmatpush3.bf16.msra.mxu1 %v4336_v16 }
 0x103   :  { %vm4885_vm10 = vmpackc.low %vm217_vm9, %vm4617_vm5  ;;  %3910 = vmatprep.subr.bf16.mxu1 %v4337_v17 }
 0x104   :  { %3851 = vmatpush3.bf16.msra.mxu0 %v4313_v33  ;;  %vm4897_vm12 = vmpackc.low %vm219_vm11, %vm4617_vm5  ;;  %v4913_v33 = vld [vmem:[#allocation5] sm:$0xff]  }
 0x105   :  { %3852 = vmatprep.subr.bf16.mxu0 %v4314_v41 }
 0x106   :  { %3911 = vmatpush3.bf16.msra.mxu1 %v4337_v17 }
 0x107   :  { %3912 = vmatprep.subr.bf16.mxu1 %v4338_v18 }
 0x108   :  { %3853 = vmatpush3.bf16.msra.mxu0 %v4314_v41 }
 0x109   :  { %3854 = vmatprep.subr.bf16.mxu0 %v4315_v42 }
 0x10a   :  { %3913 = vmatpush3.bf16.msra.mxu1 %v4338_v18 }
 0x10b   :  { %3914 = vmatprep.subr.bf16.mxu1 %v4339_v19 }
 0x10c   :  { %3855 = vmatpush3.bf16.msra.mxu0 %v4315_v42 }
 0x10d   :  { %3856 = vmatprep.subr.bf16.mxu0 %v4316_v43 }
 0x10e   :  { %3915 = vmatpush3.bf16.msra.mxu1 %v4339_v19 }
 0x10f   :  { %3916 = vmatprep.subr.bf16.mxu1 %v4340_v20 }
 0x110   :  { %3857 = vmatpush3.bf16.msra.mxu0 %v4316_v43 }
 0x111   :  { %3858 = vmatprep.subr.bf16.mxu0 %v4317_v44 }
 0x112   :  { %3917 = vmatpush3.bf16.msra.mxu1 %v4340_v20 }
 0x113   :  { %3918 = vmatprep.subr.bf16.mxu1 %v4341_v21 }
 0x114   :  { %3859 = vmatpush3.bf16.msra.mxu0 %v4317_v44 }
 0x115   :  { %3860 = vmatprep.subr.bf16.mxu0 %v4318_v45 }
 0x116   :  { %3919 = vmatpush3.bf16.msra.mxu1 %v4341_v21 }
 0x117   :  { %3920 = vmatprep.subr.bf16.mxu1 %v4342_v25 }
 0x118   :  { %3861 = vmatpush3.bf16.msra.mxu0 %v4318_v45 }
 0x119   :  { %3862 = vmatprep.subr.bf16.mxu0 %v4319_v46 }
 0x11a   :  { %3921 = vmatpush3.bf16.msra.mxu1 %v4342_v25 }
 0x11b   :  { %3922 = vmatprep.subr.bf16.mxu1 %v4343_v27 }
 0x11c   :  { %3863 = vmatpush3.bf16.msra.mxu0 %v4319_v46 }
 0x11d   :  { %3868 = vmatprep.subr.bf16.mxu0 %v4320_v48 }
 0x11e   :  { %3923 = vmatpush3.bf16.msra.mxu1 %v4343_v27 }
 0x11f   :  { %3865 = vmatmul.mubr.bf16.vlgmr.msra.gmra.mrb[0].mxu0 %v531_v53  ;;  %3928 = vmatprep.subr.bf16.mxu1 %v4913_v33 }
 0x120   :  { %3869 = vmatpush3.bf16.msra.mxu0 %v4320_v48  ;;  %3884 = vmatprep.mubr.msk.bf16.mxu0 %vm4885_vm10, %v3369_v57 }
 0x121   :  { %3870 = vmatprep.subr.bf16.mxu0 %v4321_v56 }
 0x124   :  { %3871 = vmatpush3.bf16.msra.mxu0 %v4321_v56 }
 0x125   :  { %3872 = vmatprep.subr.bf16.mxu0 %v4322_v58 }
 0x128   :  { %3873 = vmatpush3.bf16.msra.mxu0 %v4322_v58 }
 0x129   :  { %3874 = vmatprep.subr.bf16.mxu0 %v4323_v59 }
 0x12c   :  { %3875 = vmatpush3.bf16.msra.mxu0 %v4323_v59 }
 0x12d   :  { %3876 = vmatprep.subr.bf16.mxu0 %v4324_v55 }
 0x130   :  { %3877 = vmatpush3.bf16.msra.mxu0 %v4324_v55 }
 0x131   :  { %3878 = vmatprep.subr.bf16.mxu0 %v4325_v60 }
 0x134   :  { %3879 = vmatpush3.bf16.msra.mxu0 %v4325_v60 }
 0x135   :  { %3880 = vmatprep.subr.bf16.mxu0 %v4326_v61 }
 0x138   :  { %3881 = vmatpush3.bf16.msra.mxu0 %v4326_v61 }
 0x139   :  { %3882 = vmatprep.subr.bf16.mxu0 %v4327_v63 }
 0x13c   :  { %3883 = vmatpush3.bf16.msra.mxu0 %v4327_v63 }
 0x13d   :  { %3888 = vmatprep.subr.bf16.mxu0 %v4328_v2 }
 0x13f   :  { %3885 = vmatmul.mubr.msk.bf16.vlgmr.msra.gmra.mrb[0].mxu0 %vm4885_vm10, %v3372_v6 }
 0x140   :  { %3889 = vmatpush3.bf16.msra.mxu0 %v4328_v2  ;;  %3904 = vmatprep.mubr.msk.bf16.mxu0 %vm4897_vm12, %v3383_v35 }
 0x141   :  { %3890 = vmatprep.subr.bf16.mxu0 %v4329_v8 }
 0x144   :  { %3891 = vmatpush3.bf16.msra.mxu0 %v4329_v8 }
 0x145   :  { %3892 = vmatprep.subr.bf16.mxu0 %v4330_v3 }
 0x148   :  { %3893 = vmatpush3.bf16.msra.mxu0 %v4330_v3 }
 0x149   :  { %3894 = vmatprep.subr.bf16.mxu0 %v4331_v10 }
 0x14c   :  { %3895 = vmatpush3.bf16.msra.mxu0 %v4331_v10 }
 0x14d   :  { %3896 = vmatprep.subr.bf16.mxu0 %v4332_v11 }
 0x150   :  { %3897 = vmatpush3.bf16.msra.mxu0 %v4332_v11 }
 0x151   :  { %3898 = vmatprep.subr.bf16.mxu0 %v4333_v12 }
 0x154   :  { %3899 = vmatpush3.bf16.msra.mxu0 %v4333_v12 }
 0x155   :  { %3900 = vmatprep.subr.bf16.mxu0 %v4334_v14 }
 0x158   :  { %3901 = vmatpush3.bf16.msra.mxu0 %v4334_v14 }
 0x159   :  { %3902 = vmatprep.subr.bf16.mxu0 %v4335_v9 }
 0x15c   :  { %3903 = vmatpush3.bf16.msra.mxu0 %v4335_v9 }
 0x15f   :  { %3905 = vmatmul.mubr.msk.bf16.vlgmr.msra.gmra.mrb[0].mxu0 %vm4897_vm12, %v3386_v40 }
 0x1d2   :  { %v3826_v26 = vpop.f32.mrb[0].mxu1 }
 0x1d3   :  { %v401_v29 = vpop.f32.mrb[1].mxu1 }
 0x1d4   :  { %v3827_v30 = vpop.f32.mrb[2].mxu1 }
 0x1d5   :  { %v404_v32 = vpop.f32.mrb[3].mxu1 }
 0x232   :  { %v3906_v35 = vpop.f32.mrb[0].mxu0 }
 0x233   :  { %v4208_v38 = vadd.f32 %v3906_v35, %v3826_v26  ;;  %v880_v39 = vpop.f32.mrb[1].mxu0 }
 0x234   :  { %v4209_v40 = vadd.f32 %v880_v39, %v401_v29  ;;  %v3907_v41 = vpop.f32.mrb[2].mxu0 }
 0x235   :  { %v908_v42 = vadd.f32 %v4208_v38, %v3388_v37  ;;  %v4210_v43 = vadd.f32 %v3907_v41, %v3827_v30  ;;  %v883_v44 = vpop.f32.mrb[3].mxu0 }
 0x236   :  { %v906_v45 = vadd.f32 %v4209_v40, %v3388_v37  ;;  %v4211_v46 = vadd.f32 %v883_v44, %v404_v32 }
 0x237   :  { %v916_v24 = vmul.f32 0.044715, %v908_v42  ;;  %v909_v47 = vadd.f32 %v4210_v43, %v3388_v37  ;;  %v912_v11 = vmul.f32 0.5, %v908_v42 }
 0x238   :  { %v914_v48 = vmul.f32 0.044715, %v906_v45  ;;  %v907_v49 = vadd.f32 %v4211_v46, %v3388_v37  ;;  %v910_v9 = vmul.f32 0.5, %v906_v45 }
 0x239   :  { %v920_v50 = vmul.f32 %v916_v24, %v908_v42  ;;  %v917_v51 = vmul.f32 0.044715, %v909_v47  ;;  %v913_v19 = vmul.f32 0.5, %v909_v47 }
 0x23a   :  { %v918_v52 = vmul.f32 %v914_v48, %v906_v45  ;;  %v915_v53 = vmul.f32 0.044715, %v907_v49  ;;  %v911_v25 = vmul.f32 0.5, %v907_v49 }
 0x23b   :  { %v924_v56 = vmul.f32 %v920_v50, %v908_v42  ;;  %v921_v57 = vmul.f32 %v917_v51, %v909_v47 }
 0x23c   :  { %v922_v58 = vmul.f32 %v918_v52, %v906_v45  ;;  %v919_v59 = vmul.f32 %v915_v53, %v907_v49 }
 0x23d   :  { %v928_v55 = vadd.f32 %v924_v56, %v908_v42  ;;  %v925_v60 = vmul.f32 %v921_v57, %v909_v47 }
 0x23e   :  { %v926_v61 = vadd.f32 %v922_v58, %v906_v45  ;;  %v923_v63 = vmul.f32 %v919_v59, %v907_v49 }
 0x23f   :  { %v932_v1 = vmul.f32 0.7978846, %v928_v55  ;;  %v929_v2 = vadd.f32 %v925_v60, %v909_v47  ;;  %v4345_v60 = vld [vmem:[#allocation5 + $0x8] sm:$0xff]  }
 0x240   :  { %v930_v4 = vmul.f32 0.7978846, %v926_v61  ;;  %v927_v5 = vadd.f32 %v923_v63, %v907_v49 }
 0x241   :  { %4488 = vtanh.f32 %v932_v1  ;;  %v933_v6 = vmul.f32 0.7978846, %v929_v2 }
 0x242   :  { %4490 = vtanh.f32 %v930_v4  ;;  %v931_v8 = vmul.f32 0.7978846, %v927_v5 }
 0x243   :  { %4492 = vtanh.f32 %v933_v6 }
 0x244   :  { %4494 = vtanh.f32 %v931_v8 }
 0x24b   :  { %v4489_v3 = vpop.eup %4488 }
 0x24c   :  { %v4491_v10 = vpop.eup %4490  ;;  %v940_v12 = vadd.f32 1.0, %v4489_v3 }
 0x24d   :  { %v4493_v14 = vpop.eup %4492  ;;  %v938_v16 = vadd.f32 1.0, %v4491_v10 }
 0x24e   :  { %v4495_v17 = vpop.eup %4494  ;;  %v4919_v18 = vmul.f32 %v940_v12, %v912_v11  ;;  %v941_v20 = vadd.f32 1.0, %v4493_v14  ;;  %v4346_v12 = vld [vmem:[#allocation5 + $0x10] sm:$0xff]  }
 0x24f   :  { %v4921_v21 = vmul.f32 %v938_v16, %v910_v9  ;;  %v939_v26 = vadd.f32 1.0, %v4495_v17 }
 0x250   :  { %v4923_v27 = vmul.f32 %v941_v20, %v913_v19  ;;  %v978_v29 = vrot.slane %v4919_v18, 7  ;;  %v948_v30 = vrot.slane %v4919_v18, 6  ;;  %v1323_v32 = vrot.slane %v4919_v18, 1  ;;  %v4347_v19 = vld [vmem:[#allocation5 + $0x18] sm:$0xff]   ;;  %v4348_v20 = vld [vmem:[#allocation5 + $0x20] sm:$0xff]  }
 0x251   :  { %v4928_v35 = vmul.f32 %v939_v26, %v911_v25  ;;  %v976_v37 = vrot.slane %v4921_v21, 7  ;;  %v946_v38 = vrot.slane %v4921_v21, 6  ;;  %v1321_v39 = vrot.slane %v4921_v21, 1  ;;  %v4350_v25 = vld [vmem:[#allocation5 + $0x30] sm:$0xff]   ;;  %v4351_v26 = vld [vmem:[#allocation5 + $0x38] sm:$0xff]  }
 0x252   :  { %v979_v40 = vrot.slane %v4923_v27, 7  ;;  %v949_v41 = vrot.slane %v4923_v27, 6  ;;  %v1219_v42 = vpack.c.bf16 %v4923_v27, %v4919_v18  ;;  %v1324_v43 = vrot.slane %v4923_v27, 1 }
 0x253   :  { %v977_v44 = vrot.slane %v4928_v35, 7  ;;  %v947_v45 = vrot.slane %v4928_v35, 6  ;;  %v1218_v46 = vpack.c.bf16 %v4928_v35, %v4921_v21  ;;  %v1322_v24 = vrot.slane %v4928_v35, 1 }
 0x254   :  { %v983_v47 = vsel %vm291_vm1, %v979_v40, %v976_v37  ;;  %v980_v48 = vsel %vm291_vm1, %v978_v29, %v979_v40  ;;  %v953_v49 = vsel %vm260_vm3, %v949_v41, %v946_v38  ;;  %v950_v50 = vsel %vm260_vm3, %v948_v30, %v949_v41  ;;  %v4359_v40 = vld [vmem:[#allocation5 + $0xb8] sm:$0xff]   ;;  %v4360_v41 = vld [vmem:[#allocation5 + $0xc0] sm:$0xff]  }
 0x255   :  { %v982_v51 = vsel %vm291_vm1, %v976_v37, %v977_v44  ;;  %v981_v52 = vsel %vm291_vm1, %v977_v44, %v978_v29  ;;  %v952_v53 = vsel %vm260_vm3, %v946_v38, %v947_v45  ;;  %v951_v56 = vsel %vm260_vm3, %v947_v45, %v948_v30  ;;  %v4352_v29 = vld [vmem:[#allocation5 + $0x80] sm:$0xff]   ;;  %v4353_v30 = vld [vmem:[#allocation5 + $0x88] sm:$0xff]   ;;  %v4362_v44 = vld [vmem:[#allocation5 + $0xd0] sm:$0xff]  }
 0x256   :  { %v3398_v57 = vpack.c.bf16 %v982_v51, %v983_v47  ;;  %v3401_v58 = vpack.c.bf16 %v980_v48, %v981_v52  ;;  %v3412_v59 = vpack.c.bf16 %v952_v53, %v953_v49  ;;  %v3415_v55 = vpack.c.bf16 %v950_v50, %v951_v56  ;;  %v4356_v37 = vld [vmem:[#allocation5 + $0xa0] sm:$0xff]   ;;  %v4357_v38 = vld [vmem:[#allocation5 + $0xa8] sm:$0xff]   ;;  %v4363_v45 = vld [vmem:[#allocation5 + $0xd8] sm:$0xff]  }
 0x257   :  { %v4961_v61 = vsel %vm637_vm8, %v1322_v24, %v1323_v32  ;;  %v4965_v63 = vsel %vm637_vm8, %v1321_v39, %v1322_v24  ;;  %v4969_v1 = vsel %vm637_vm8, %v1323_v32, %v1324_v43  ;;  %v4973_v2 = vsel %vm637_vm8, %v1324_v43, %v1321_v39  ;;  %v4354_v32 = vld [vmem:[#allocation5 + $0x90] sm:$0xff]   ;;  %v4361_v43 = vld [vmem:[#allocation5 + $0xc8] sm:$0xff]   ;;  %v4371_v49 = vld [vmem:[#allocation5 + $0x118] sm:$0xff]  }
 0x258   :  { %3924 = vmatprep.mubr.msk.bf16.mxu1 %vm4822_vm6, %v3398_v57  ;;  %v3434_v4 = vpack.c.bf16 %v4961_v61, %v4965_v63  ;;  %v3437_v5 = vpack.c.bf16 %v4973_v2, %v4969_v1  ;;  %v1453_v6 = vrot.slane %v4921_v21, 2  ;;  %v1454_v8 = vrot.slane %v4928_v35, 2  ;;  %v4349_v21 = vld [vmem:[#allocation5 + $0x28] sm:$0xff]   ;;  %v4355_v35 = vld [vmem:[#allocation5 + $0x98] sm:$0xff]   ;;  %v4358_v39 = vld [vmem:[#allocation5 + $0xb0] sm:$0xff]  }
 0x259   :  { %3925 = vmatmul.mubr.msk.bf16.vlgmr.msra.gmra.mrb[4].mxu1 %vm4822_vm6, %v3401_v58  ;;  %v1455_v3 = vrot.slane %v4919_v18, 2  ;;  %v1456_v10 = vrot.slane %v4923_v27, 2  ;;  %v4365_v24 = vld [vmem:[#allocation5 + $0xe8] sm:$0xff]   ;;  %v4366_v18 = vld [vmem:[#allocation5 + $0xf0] sm:$0xff]   ;;  %v4367_v27 = vld [vmem:[#allocation5 + $0xf8] sm:$0xff]  }
 0x25a   :  { %3929 = vmatpush3.bf16.msra.mxu1 %v4913_v33  ;;  %3944 = vmatprep.mubr.msk.bf16.mxu1 %vm4842_vm7, %v3412_v59  ;;  %v4992_v11 = vsel %vm770_vm2, %v1453_v6, %v1454_v8  ;;  %v4369_v47 = vld [vmem:[#allocation5 + $0x108] sm:$0xff]   ;;  %v4370_v48 = vld [vmem:[#allocation5 + $0x110] sm:$0xff]   ;;  %v4372_v50 = vld [vmem:[#allocation5 + $0x120] sm:$0xff]   ;;  %v4618_v2 = vmov 1966171168  }
 0x25b   :  { %3930 = vmatprep.subr.bf16.mxu1 %v4345_v60  ;;  %v4996_v14 = vsel %vm770_vm2, %v1454_v8, %v1455_v3  ;;  %v5000_v9 = vsel %vm770_vm2, %v1455_v3, %v1456_v10  ;;  %v5004_v33 = vsel %vm770_vm2, %v1456_v10, %v1453_v6  ;;  %v4373_v51 = vld [vmem:[#allocation5 + $0x128] sm:$0xff]   ;;  %v4374_v52 = vld [vmem:[#allocation5 + $0x130] sm:$0xff]   ;;  %v4375_v53 = vld [vmem:[#allocation5 + $0x138] sm:$0xff]  }
 0x25c   :  { %v3448_v16 = vpack.c.bf16 %v4996_v14, %v4992_v11  ;;  %v3451_v17 = vpack.c.bf16 %v5004_v33, %v5000_v9  ;;  %v4376_v56 = vld [vmem:[#allocation2 + $0x180] sm:$0xff]   ;;  %v4377_v57 = vld [vmem:[#allocation2 + $0x188] sm:$0xff]   ;;  %v4378_v58 = vld [vmem:[#allocation2 + $0x190] sm:$0xff]  }
 0x25d   :  { %4008 = vmatprep.subr.bf16.mxu0 %v4376_v56  ;;  %v4379_v59 = vld [vmem:[#allocation2 + $0x198] sm:$0xff]   ;;  %v4382_v61 = vld [vmem:[#allocation2 + $0x1b0] sm:$0xff]   ;;  %v5035_v1 = vld [vmem:[#allocation2 + $0x140] sm:$0xff]  }
 0x25e   :  { %3931 = vmatpush3.bf16.msra.mxu1 %v4345_v60  ;;  %4009 = vmatpush3.bf16.msra.mxu0 %v4376_v56  ;;  %v4381_v60 = vld [vmem:[#allocation2 + $0x1a8] sm:$0xff]   ;;  %v4383_v63 = vld [vmem:[#allocation2 + $0x1b8] sm:$0xff]  }
 0x25f   :  { %3932 = vmatprep.subr.bf16.mxu1 %v4346_v12  ;;  %4010 = vmatprep.subr.bf16.mxu0 %v4377_v57  ;;  %v3454_v6 = vld.sshfl [vmem:[%s5382_s1] sm:$0x11 pattern:$0x75316420] }
 0x260   :  { %v3455_v8 = vld.sshfl [vmem:[%s5383_s2] sm:$0x11 pattern:$0x75316420]  ;;  %v1605_v3 = vcombine.high %v3454_v6, %v3454_v6 }
 0x261   :  { %v1639_v11 = vcombine.high %v3455_v8, %v3455_v8  ;;  %v3453_v33 = vld [vmem:[%s5389_s8] ss:$0 sm:$0xff] }
 0x262   :  { %3933 = vmatpush3.bf16.msra.mxu1 %v4346_v12  ;;  %4011 = vmatpush3.bf16.msra.mxu0 %v4377_v57 }
 0x263   :  { %3934 = vmatprep.subr.bf16.mxu1 %v4347_v19  ;;  %4012 = vmatprep.subr.bf16.mxu0 %v4378_v58 }
 0x266   :  { %3935 = vmatpush3.bf16.msra.mxu1 %v4347_v19  ;;  %4013 = vmatpush3.bf16.msra.mxu0 %v4378_v58 }
 0x267   :  { %3936 = vmatprep.subr.bf16.mxu1 %v4348_v20  ;;  %4014 = vmatprep.subr.bf16.mxu0 %v4379_v59 }
 0x26a   :  { %3937 = vmatpush3.bf16.msra.mxu1 %v4348_v20  ;;  %4015 = vmatpush3.bf16.msra.mxu0 %v4379_v59 }
 0x26b   :  { %3938 = vmatprep.subr.bf16.mxu1 %v4349_v21 }
 0x26e   :  { %3939 = vmatpush3.bf16.msra.mxu1 %v4349_v21 }
 0x26f   :  { %3940 = vmatprep.subr.bf16.mxu1 %v4350_v25 }
 0x272   :  { %3941 = vmatpush3.bf16.msra.mxu1 %v4350_v25 }
 0x273   :  { %3942 = vmatprep.subr.bf16.mxu1 %v4351_v26 }
 0x276   :  { %3943 = vmatpush3.bf16.msra.mxu1 %v4351_v26 }
 0x277   :  { %3948 = vmatprep.subr.bf16.mxu1 %v4352_v29 }
 0x279   :  { %3945 = vmatmul.mubr.msk.bf16.vlgmr.msra.gmra.mrb[4].mxu1 %vm4842_vm7, %v3415_v55  ;;  %v4380_v55 = vld [vmem:[#allocation2 + $0x1a0] sm:$0xff]  }
 0x27a   :  { %3949 = vmatpush3.bf16.msra.mxu1 %v4352_v29  ;;  %3964 = vmatprep.mubr.bf16.mxu1 %v1218_v46  ;;  %v4364_v46 = vld [vmem:[#allocation5 + $0xe0] sm:$0xff]  }
 0x27b   :  { %3950 = vmatprep.subr.bf16.mxu1 %v4353_v30  ;;  %4016 = vmatprep.subr.bf16.mxu0 %v4380_v55 }
 0x27c   :  { %4017 = vmatpush3.bf16.msra.mxu0 %v4380_v55 }
 0x27d   :  { %4018 = vmatprep.subr.bf16.mxu0 %v4381_v60 }
 0x27e   :  { %3951 = vmatpush3.bf16.msra.mxu1 %v4353_v30 }
 0x27f   :  { %3952 = vmatprep.subr.bf16.mxu1 %v4354_v32 }
 0x280   :  { %4019 = vmatpush3.bf16.msra.mxu0 %v4381_v60 }
 0x281   :  { %4020 = vmatprep.subr.bf16.mxu0 %v4382_v61 }
 0x282   :  { %3953 = vmatpush3.bf16.msra.mxu1 %v4354_v32 }
 0x283   :  { %3954 = vmatprep.subr.bf16.mxu1 %v4355_v35 }
 0x284   :  { %4021 = vmatpush3.bf16.msra.mxu0 %v4382_v61 }
 0x285   :  { %4022 = vmatprep.subr.bf16.mxu0 %v4383_v63 }
 0x286   :  { %3955 = vmatpush3.bf16.msra.mxu1 %v4355_v35 }
 0x287   :  { %3956 = vmatprep.subr.bf16.mxu1 %v4356_v37 }
 0x288   :  { %4023 = vmatpush3.bf16.msra.mxu0 %v4383_v63 }
 0x289   :  { %4028 = vmatprep.subr.bf16.mxu0 %v5035_v1 }
 0x28a   :  { %3957 = vmatpush3.bf16.msra.mxu1 %v4356_v37 }
 0x28b   :  { %3958 = vmatprep.subr.bf16.mxu1 %v4357_v38 }
 0x28e   :  { %3959 = vmatpush3.bf16.msra.mxu1 %v4357_v38 }
 0x28f   :  { %3960 = vmatprep.subr.bf16.mxu1 %v4358_v39 }
 0x292   :  { %3961 = vmatpush3.bf16.msra.mxu1 %v4358_v39 }
 0x293   :  { %3962 = vmatprep.subr.bf16.mxu1 %v4359_v40 }
 0x296   :  { %3963 = vmatpush3.bf16.msra.mxu1 %v4359_v40 }
 0x297   :  { %3968 = vmatprep.subr.bf16.mxu1 %v4360_v41 }
 0x299   :  { %3965 = vmatmul.mubr.bf16.vlgmr.msra.gmra.mrb[4].mxu1 %v1219_v42  ;;  %v4368_v42 = vld [vmem:[#allocation5 + $0x100] sm:$0xff]  }
 0x29a   :  { %3969 = vmatpush3.bf16.msra.mxu1 %v4360_v41  ;;  %3984 = vmatprep.mubr.msk.bf16.mxu1 %vm4885_vm10, %v3434_v4  ;;  %v1607_v4 = vunpack.c.l.s4 %v4618_v2 }
 0x29b   :  { %3970 = vmatprep.subr.bf16.mxu1 %v4361_v43 }
 0x29e   :  { %3971 = vmatpush3.bf16.msra.mxu1 %v4361_v43 }
 0x29f   :  { %3972 = vmatprep.subr.bf16.mxu1 %v4362_v44 }
 0x2a2   :  { %3973 = vmatpush3.bf16.msra.mxu1 %v4362_v44 }
 0x2a3   :  { %3974 = vmatprep.subr.bf16.mxu1 %v4363_v45 }
 0x2a6   :  { %3975 = vmatpush3.bf16.msra.mxu1 %v4363_v45 }
 0x2a7   :  { %3976 = vmatprep.subr.bf16.mxu1 %v4364_v46 }
 0x2aa   :  { %3977 = vmatpush3.bf16.msra.mxu1 %v4364_v46 }
 0x2ab   :  { %3978 = vmatprep.subr.bf16.mxu1 %v4365_v24 }
 0x2ae   :  { %3979 = vmatpush3.bf16.msra.mxu1 %v4365_v24 }
 0x2af   :  { %3980 = vmatprep.subr.bf16.mxu1 %v4366_v18 }
 0x2b2   :  { %3981 = vmatpush3.bf16.msra.mxu1 %v4366_v18 }
 0x2b3   :  { %3982 = vmatprep.subr.bf16.mxu1 %v4367_v27 }
 0x2b6   :  { %3983 = vmatpush3.bf16.msra.mxu1 %v4367_v27 }
 0x2b7   :  { %3988 = vmatprep.subr.bf16.mxu1 %v4368_v42 }
 0x2b9   :  { %3985 = vmatmul.mubr.msk.bf16.vlgmr.msra.gmra.mrb[4].mxu1 %vm4885_vm10, %v3437_v5  ;;  %v1608_v5 = vunpack.c.0.s8 %v1607_v4 }
 0x2ba   :  { %3989 = vmatpush3.bf16.msra.mxu1 %v4368_v42  ;;  %4004 = vmatprep.mubr.msk.bf16.mxu1 %vm4897_vm12, %v3448_v16 }
 0x2bb   :  { %3990 = vmatprep.subr.bf16.mxu1 %v4369_v47  ;;  %v5045_v10 = vsub.s32 %v1608_v5, %v4742_v28 }
 0x2bd   :  { %v1619_v12 = vrot.slane %v1605_v3, %v5045_v10  ;;  %v1612_v14 = vrot.slane %v3454_v6, %v5045_v10  ;;  %v1653_v9 = vrot.slane %v1639_v11, %v5045_v10  ;;  %v1646_v16 = vrot.slane %v3455_v8, %v5045_v10 }
 0x2be   :  { %3991 = vmatpush3.bf16.msra.mxu1 %v4369_v47 }
 0x2bf   :  { %3992 = vmatprep.subr.bf16.mxu1 %v4370_v48  ;;  %v1623_v20 = vrot.slane %v1612_v14, %v4745_v31  ;;  %v1661_v25 = vrot.slane %v1653_v9, %v4745_v31  ;;  %v1657_v30 = vrot.slane %v1646_v16, %v4745_v31 }
 0x2c2   :  { %3993 = vmatpush3.bf16.msra.mxu1 %v4370_v48 }
 0x2c3   :  { %3994 = vmatprep.subr.bf16.mxu1 %v4371_v49 }
 0x2c6   :  { %3995 = vmatpush3.bf16.msra.mxu1 %v4371_v49 }
 0x2c7   :  { %3996 = vmatprep.subr.bf16.mxu1 %v4372_v50 }
 0x2ca   :  { %3997 = vmatpush3.bf16.msra.mxu1 %v4372_v50 }
 0x2cb   :  { %3998 = vmatprep.subr.bf16.mxu1 %v4373_v51 }
 0x2ce   :  { %3999 = vmatpush3.bf16.msra.mxu1 %v4373_v51 }
 0x2cf   :  { %4000 = vmatprep.subr.bf16.mxu1 %v4374_v52 }
 0x2d2   :  { %4001 = vmatpush3.bf16.msra.mxu1 %v4374_v52 }
 0x2d3   :  { %4002 = vmatprep.subr.bf16.mxu1 %v4375_v53 }
 0x2d6   :  { %4003 = vmatpush3.bf16.msra.mxu1 %v4375_v53 }
 0x2d9   :  { %4005 = vmatmul.mubr.msk.bf16.vlgmr.msra.gmra.mrb[4].mxu1 %vm4897_vm12, %v3451_v17  ;;  %v1627_v17 = vrot.slane %v1619_v12, %v4745_v31 }
 0x3ac   :  { %v4006_v19 = vpop.f32.mrb[4].mxu1 }
 0x3ad   :  { %v1594_v21 = vadd.f32 %v4006_v19, %v3453_v33  ;;  %v1566_v26 = vpop.f32.mrb[5].mxu1 }
 0x3ae   :  { %v1592_v29 = vadd.f32 %v3453_v33, %v1566_v26  ;;  %v4007_v32 = vpop.f32.mrb[6].mxu1 }
 0x3af   :  { %v1666_v35 = vmul.f32 %v1627_v17, %v1594_v21  ;;  %v1595_v37 = vadd.f32 %v4007_v32, %v3453_v33  ;;  %v1569_v38 = vpop.f32.mrb[7].mxu1 }
 0x3b0   :  { %v1664_v39 = vmul.f32 %v1623_v20, %v1592_v29  ;;  %v1593_v40 = vadd.f32 %v3453_v33, %v1569_v38 }
 0x3b1   :  { %v1670_v41 = vadd.f32 %v1666_v35, %v1661_v25  ;;  %v1667_v43 = vmul.f32 %v1627_v17, %v1595_v37 }
 0x3b2   :  { %v1668_v44 = vadd.f32 %v1664_v39, %v1657_v30  ;;  %v1665_v45 = vmul.f32 %v1623_v20, %v1593_v40 }
 0x3b3   :  { %v5059_v46 = vadd.f32 %v1670_v41, %v4763_v13  ;;  %v1671_v24 = vadd.f32 %v1667_v43, %v1661_v25 }
 0x3b4   :  { %v5062_v18 = vadd.f32 %v1668_v44, %v4759_v62  ;;  %v1669_v27 = vadd.f32 %v1665_v45, %v1657_v30 }
 0x3b5   :  { %v1682_v42 = vmul.f32 0.044715, %v5059_v46  ;;  %v5066_v47 = vadd.f32 %v1671_v24, %v4774_v34  ;;  %v1678_v8 = vmul.f32 0.5, %v5059_v46 }
 0x3b6   :  { %v1680_v48 = vmul.f32 0.044715, %v5062_v18  ;;  %v5070_v49 = vadd.f32 %v1669_v27, %v4768_v22  ;;  %v1676_v12 = vmul.f32 0.5, %v5062_v18 }
 0x3b7   :  { %v1686_v50 = vmul.f32 %v1682_v42, %v5059_v46  ;;  %v1683_v13 = vmul.f32 0.044715, %v5066_v47  ;;  %v1679_v16 = vmul.f32 0.5, %v5066_v47 }
 0x3b8   :  { %v1684_v51 = vmul.f32 %v1680_v48, %v5062_v18  ;;  %v1681_v62 = vmul.f32 0.044715, %v5070_v49  ;;  %v1677_v19 = vmul.f32 0.5, %v5070_v49 }
 0x3b9   :  { %v1690_v52 = vmul.f32 %v1686_v50, %v5059_v46  ;;  %v1687_v53 = vmul.f32 %v1683_v13, %v5066_v47 }
 0x3ba   :  { %v1688_v34 = vmul.f32 %v1684_v51, %v5062_v18  ;;  %v1685_v56 = vmul.f32 %v1681_v62, %v5070_v49 }
 0x3bb   :  { %v1694_v57 = vadd.f32 %v1690_v52, %v5059_v46  ;;  %v1691_v22 = vmul.f32 %v1687_v53, %v5066_v47  ;;  %v4385_v53 = vld [vmem:[#allocation2 + $0x148] sm:$0xff]  }
 0x3bc   :  { %v1692_v58 = vadd.f32 %v1688_v34, %v5062_v18  ;;  %v1689_v59 = vmul.f32 %v1685_v56, %v5070_v49 }
 0x3bd   :  { %v1698_v55 = vmul.f32 0.7978846, %v1694_v57  ;;  %v1695_v60 = vadd.f32 %v1691_v22, %v5066_v47 }
 0x3be   :  { %v1696_v61 = vmul.f32 0.7978846, %v1692_v58  ;;  %v1693_v63 = vadd.f32 %v1689_v59, %v5070_v49 }
 0x3bf   :  { %4496 = vtanh.f32 %v1698_v55  ;;  %v1699_v2 = vmul.f32 0.7978846, %v1695_v60 }
 0x3c0   :  { %4498 = vtanh.f32 %v1696_v61  ;;  %v1697_v4 = vmul.f32 0.7978846, %v1693_v63 }
 0x3c1   :  { %4500 = vtanh.f32 %v1699_v2 }
 0x3c2   :  { %4502 = vtanh.f32 %v1697_v4  ;;  %v4386_v4 = vld [vmem:[#allocation2 + $0x150] sm:$0xff]  }
 0x3c9   :  { %v4497_v5 = vpop.eup %4496 }
 0x3ca   :  { %v4499_v6 = vpop.eup %4498  ;;  %v1706_v3 = vadd.f32 1.0, %v4497_v5 }
 0x3cb   :  { %v4501_v11 = vpop.eup %4500  ;;  %v1704_v14 = vadd.f32 1.0, %v4499_v6 }
 0x3cc   :  { %v4503_v9 = vpop.eup %4502  ;;  %v5088_v33 = vmul.f32 %v1706_v3, %v1678_v8  ;;  %v1707_v17 = vadd.f32 1.0, %v4501_v11  ;;  %v4387_v11 = vld [vmem:[#allocation2 + $0x158] sm:$0xff]  }
 0x3cd   :  { %v1705_v20 = vadd.f32 1.0, %v4503_v9  ;;  %v5092_v21 = vmul.f32 %v1704_v14, %v1676_v12  ;;  %v4388_v12 = vld [vmem:[#allocation2 + $0x160] sm:$0xff]   ;;  %v4389_v14 = vld [vmem:[#allocation2 + $0x168] sm:$0xff]   ;;  %v4390_v9 = vld [vmem:[#allocation2 + $0x170] sm:$0xff]  }
 0x3ce   :  { %v5094_v25 = vmul.f32 %v1707_v17, %v1679_v16  ;;  %v1745_v30 = vrot.slane %v5088_v33, 7  ;;  %v2090_v13 = vrot.slane %v5088_v33, 1  ;;  %v2222_v61 = vrot.slane %v5088_v33, 2  ;;  %v4391_v16 = vld [vmem:[#allocation2 + $0x178] sm:$0xff]  }
 0x3cf   :  { %v5096_v26 = vmul.f32 %v1705_v20, %v1677_v19  ;;  %v1743_v29 = vrot.slane %v5092_v21, 7  ;;  %v1712_v32 = vrot.slane %v5092_v21, 6  ;;  %v2088_v39 = vrot.slane %v5092_v21, 1  ;;  %v4392_v19 = vld [vmem:[#allocation2 + $0x1c0] sm:$0xff]  }
 0x3d0   :  { %v1746_v35 = vrot.slane %v5094_v25, 7  ;;  %v1715_v37 = vrot.slane %v5094_v25, 6  ;;  %v1986_v38 = vpack.c.bf16 %v5094_v25, %v5088_v33  ;;  %v2091_v44 = vrot.slane %v5094_v25, 1 }
 0x3d1   :  { %v1744_v40 = vrot.slane %v5096_v26, 7  ;;  %v1713_v41 = vrot.slane %v5096_v26, 6  ;;  %v2089_v43 = vrot.slane %v5096_v26, 1  ;;  %v2220_v55 = vrot.slane %v5092_v21, 2 }
 0x3d2   :  { %v1750_v45 = vsel %vm291_vm1, %v1746_v35, %v1743_v29  ;;  %v1747_v24 = vsel %vm291_vm1, %v1745_v30, %v1746_v35  ;;  %v1719_v27 = vsel %vm260_vm3, %v1715_v37, %v1712_v32  ;;  %v5133_v57 = vsel %vm637_vm8, %v2090_v13, %v2091_v44 }
 0x3d3   :  { %v1749_v42 = vsel %vm291_vm1, %v1743_v29, %v1744_v40  ;;  %v1748_v48 = vsel %vm291_vm1, %v1744_v40, %v1745_v30  ;;  %v1718_v50 = vsel %vm260_vm3, %v1712_v32, %v1713_v41  ;;  %v5125_v34 = vsel %vm637_vm8, %v2089_v43, %v2090_v13  ;;  %v4393_v32 = vld [vmem:[#allocation2 + $0x1c8] sm:$0xff]   ;;  %v4396_v40 = vld [vmem:[#allocation2 + $0x1e0] sm:$0xff]   ;;  %v4411_v13 = vld [vmem:[#allocation2 + $0x258] sm:$0xff]  }
 0x3d4   :  { %v3465_v51 = vpack.c.bf16 %v1749_v42, %v1750_v45  ;;  %v3468_v62 = vpack.c.bf16 %v1747_v24, %v1748_v48  ;;  %v3479_v52 = vpack.c.bf16 %v1718_v50, %v1719_v27  ;;  %v5129_v56 = vsel %vm637_vm8, %v2088_v39, %v2089_v43  ;;  %v4398_v43 = vld [vmem:[#allocation2 + $0x1f0] sm:$0xff]   ;;  %v4403_v24 = vld [vmem:[#allocation2 + $0x218] sm:$0xff]   ;;  %v4404_v27 = vld [vmem:[#allocation2 + $0x220] sm:$0xff]  }
 0x3d5   :  { %v5137_v22 = vsel %vm637_vm8, %v2091_v44, %v2088_v39  ;;  %v3501_v58 = vpack.c.bf16 %v5125_v34, %v5129_v56  ;;  %v2221_v60 = vrot.slane %v5096_v26, 2  ;;  %v2223_v63 = vrot.slane %v5094_v25, 2  ;;  %v4394_v39 = vld [vmem:[#allocation2 + $0x1d0] sm:$0xff]   ;;  %v4401_v44 = vld [vmem:[#allocation2 + $0x208] sm:$0xff]   ;;  %v4407_v25 = vld [vmem:[#allocation2 + $0x238] sm:$0xff]  }
 0x3d6   :  { %4024 = vmatprep.mubr.msk.bf16.mxu0 %vm4822_vm6, %v3465_v51  ;;  %v3504_v59 = vpack.c.bf16 %v5137_v22, %v5133_v57  ;;  %v1714_v17 = vrot.slane %v5088_v33, 6  ;;  %v1985_v35 = vpack.c.bf16 %v5096_v26, %v5092_v21  ;;  %v4399_v21 = vld [vmem:[#allocation2 + $0x1f8] sm:$0xff]   ;;  %v4400_v26 = vld [vmem:[#allocation2 + $0x200] sm:$0xff]   ;;  %v4402_v45 = vld [vmem:[#allocation2 + $0x210] sm:$0xff]  }
 0x3d7   :  { %4025 = vmatmul.mubr.msk.bf16.vlgmr.msra.gmra.mrb[4].mxu0 %vm4822_vm6, %v3468_v62  ;;  %v5156_v2 = vsel %vm770_vm2, %v2220_v55, %v2221_v60  ;;  %v5160_v5 = vsel %vm770_vm2, %v2221_v60, %v2222_v61  ;;  %v5164_v6 = vsel %vm770_vm2, %v2222_v61, %v2223_v63  ;;  %v4405_v42 = vld [vmem:[#allocation2 + $0x228] sm:$0xff]   ;;  %v4406_v33 = vld [vmem:[#allocation2 + $0x230] sm:$0xff]   ;;  %v4412_v51 = vld [vmem:[#allocation2 + $0x260] sm:$0xff]  }
 0x3d8   :  { %4029 = vmatpush3.bf16.msra.mxu0 %v5035_v1  ;;  %4044 = vmatprep.mubr.msk.bf16.mxu0 %vm4842_vm7, %v3479_v52  ;;  %v5168_v1 = vsel %vm770_vm2, %v2223_v63, %v2220_v55  ;;  %v3515_v8 = vpack.c.bf16 %v5160_v5, %v5156_v2  ;;  %v1716_v20 = vsel %vm260_vm3, %v1714_v17, %v1715_v37  ;;  %v4395_v37 = vld [vmem:[#allocation2 + $0x1d8] sm:$0xff]   ;;  %v4409_v48 = vld [vmem:[#allocation2 + $0x248] sm:$0xff]   ;;  %v4410_v50 = vld [vmem:[#allocation2 + $0x250] sm:$0xff]  }
 0x3d9   :  { %4030 = vmatprep.subr.bf16.mxu0 %v4385_v53  ;;  %v3518_v3 = vpack.c.bf16 %v5168_v1, %v5164_v6  ;;  %v1717_v29 = vsel %vm260_vm3, %v1713_v41, %v1714_v17  ;;  %v4397_v41 = vld [vmem:[#allocation2 + $0x1e8] sm:$0xff]   ;;  %v4414_v52 = vld [vmem:[#allocation2 + $0x270] sm:$0xff]   ;;  %v4416_v34 = vld [vmem:[#allocation5 + $0x180] sm:$0xff]  }
 0x3da   :  { %v3482_v30 = vpack.c.bf16 %v1716_v20, %v1717_v29  ;;  %v4413_v62 = vld [vmem:[#allocation2 + $0x268] sm:$0xff]   ;;  %4108 = vmatprep.subr.bf16.mxu1 %v4416_v34  ;;  %v4418_v57 = vld [vmem:[#allocation5 + $0x190] sm:$0xff]   ;;  %v4419_v22 = vld [vmem:[#allocation5 + $0x198] sm:$0xff]  }
 0x3db   :  { %4109 = vmatpush3.bf16.msra.mxu1 %v4416_v34  ;;  %v4417_v56 = vld [vmem:[#allocation5 + $0x188] sm:$0xff]   ;;  %v4422_v55 = vld [vmem:[#allocation5 + $0x1b0] sm:$0xff]   ;;  %v4423_v60 = vld [vmem:[#allocation5 + $0x1b8] sm:$0xff]  }
 0x3dc   :  { %4031 = vmatpush3.bf16.msra.mxu0 %v4385_v53  ;;  %v4415_v53 = vld [vmem:[#allocation2 + $0x278] sm:$0xff]   ;;  %4110 = vmatprep.subr.bf16.mxu1 %v4417_v56  ;;  %v5207_v61 = vld [vmem:[#allocation5 + $0x140] sm:$0xff]   ;;  %v3521_v63 = vld [vmem:[%s5387_s6 + $0x1] ss:$0 sm:$0xff] }
 0x3dd   :  { %4032 = vmatprep.subr.bf16.mxu0 %v4386_v4 }
 0x3df   :  { %4111 = vmatpush3.bf16.msra.mxu1 %v4417_v56 }
 0x3e0   :  { %4033 = vmatpush3.bf16.msra.mxu0 %v4386_v4  ;;  %4112 = vmatprep.subr.bf16.mxu1 %v4418_v57 }
 0x3e1   :  { %4034 = vmatprep.subr.bf16.mxu0 %v4387_v11 }
 0x3e3   :  { %4113 = vmatpush3.bf16.msra.mxu1 %v4418_v57 }
 0x3e4   :  { %4035 = vmatpush3.bf16.msra.mxu0 %v4387_v11  ;;  %4114 = vmatprep.subr.bf16.mxu1 %v4419_v22 }
 0x3e5   :  { %4036 = vmatprep.subr.bf16.mxu0 %v4388_v12 }
 0x3e7   :  { %4115 = vmatpush3.bf16.msra.mxu1 %v4419_v22 }
 0x3e8   :  { %4037 = vmatpush3.bf16.msra.mxu0 %v4388_v12 }
 0x3e9   :  { %4038 = vmatprep.subr.bf16.mxu0 %v4389_v14 }
 0x3ec   :  { %4039 = vmatpush3.bf16.msra.mxu0 %v4389_v14 }
 0x3ed   :  { %4040 = vmatprep.subr.bf16.mxu0 %v4390_v9 }
 0x3f0   :  { %4041 = vmatpush3.bf16.msra.mxu0 %v4390_v9 }
 0x3f1   :  { %4042 = vmatprep.subr.bf16.mxu0 %v4391_v16 }
 0x3f4   :  { %4043 = vmatpush3.bf16.msra.mxu0 %v4391_v16 }
 0x3f5   :  { %4048 = vmatprep.subr.bf16.mxu0 %v4392_v19 }
 0x3f7   :  { %4045 = vmatmul.mubr.msk.bf16.vlgmr.msra.gmra.mrb[4].mxu0 %vm4842_vm7, %v3482_v30 }
 0x3f8   :  { %4049 = vmatpush3.bf16.msra.mxu0 %v4392_v19  ;;  %4064 = vmatprep.mubr.bf16.mxu0 %v1985_v35 }
 0x3f9   :  { %4050 = vmatprep.subr.bf16.mxu0 %v4393_v32 }
 0x3fc   :  { %4051 = vmatpush3.bf16.msra.mxu0 %v4393_v32 }
 0x3fd   :  { %4052 = vmatprep.subr.bf16.mxu0 %v4394_v39 }
 0x400   :  { %4053 = vmatpush3.bf16.msra.mxu0 %v4394_v39 }
 0x401   :  { %4054 = vmatprep.subr.bf16.mxu0 %v4395_v37 }
 0x404   :  { %4055 = vmatpush3.bf16.msra.mxu0 %v4395_v37 }
 0x405   :  { %4056 = vmatprep.subr.bf16.mxu0 %v4396_v40 }
 0x408   :  { %4057 = vmatpush3.bf16.msra.mxu0 %v4396_v40 }
 0x409   :  { %4058 = vmatprep.subr.bf16.mxu0 %v4397_v41 }
 0x40c   :  { %4059 = vmatpush3.bf16.msra.mxu0 %v4397_v41 }
 0x40d   :  { %4060 = vmatprep.subr.bf16.mxu0 %v4398_v43 }
 0x410   :  { %4061 = vmatpush3.bf16.msra.mxu0 %v4398_v43 }
 0x411   :  { %4062 = vmatprep.subr.bf16.mxu0 %v4399_v21 }
 0x414   :  { %4063 = vmatpush3.bf16.msra.mxu0 %v4399_v21 }
 0x415   :  { %4068 = vmatprep.subr.bf16.mxu0 %v4400_v26 }
 0x417   :  { %4065 = vmatmul.mubr.bf16.vlgmr.msra.gmra.mrb[4].mxu0 %v1986_v38  ;;  %v4408_v38 = vld [vmem:[#allocation2 + $0x240] sm:$0xff]  }
 0x418   :  { %4069 = vmatpush3.bf16.msra.mxu0 %v4400_v26  ;;  %4084 = vmatprep.mubr.msk.bf16.mxu0 %vm4885_vm10, %v3501_v58  ;;  %v4420_v58 = vld [vmem:[#allocation5 + $0x1a0] sm:$0xff]  }
 0x419   :  { %4070 = vmatprep.subr.bf16.mxu0 %v4401_v44  ;;  %4116 = vmatprep.subr.bf16.mxu1 %v4420_v58 }
 0x41a   :  { %4117 = vmatpush3.bf16.msra.mxu1 %v4420_v58 }
 0x41c   :  { %4071 = vmatpush3.bf16.msra.mxu0 %v4401_v44 }
 0x41d   :  { %4072 = vmatprep.subr.bf16.mxu0 %v4402_v45 }
 0x420   :  { %4073 = vmatpush3.bf16.msra.mxu0 %v4402_v45 }
 0x421   :  { %4074 = vmatprep.subr.bf16.mxu0 %v4403_v24 }
 0x424   :  { %4075 = vmatpush3.bf16.msra.mxu0 %v4403_v24 }
 0x425   :  { %4076 = vmatprep.subr.bf16.mxu0 %v4404_v27 }
 0x428   :  { %4077 = vmatpush3.bf16.msra.mxu0 %v4404_v27 }
 0x429   :  { %4078 = vmatprep.subr.bf16.mxu0 %v4405_v42 }
 0x42c   :  { %4079 = vmatpush3.bf16.msra.mxu0 %v4405_v42 }
 0x42d   :  { %4080 = vmatprep.subr.bf16.mxu0 %v4406_v33 }
 0x430   :  { %4081 = vmatpush3.bf16.msra.mxu0 %v4406_v33 }
 0x431   :  { %4082 = vmatprep.subr.bf16.mxu0 %v4407_v25 }
 0x434   :  { %4083 = vmatpush3.bf16.msra.mxu0 %v4407_v25 }
 0x435   :  { %4088 = vmatprep.subr.bf16.mxu0 %v4408_v38 }
 0x437   :  { %4085 = vmatmul.mubr.msk.bf16.vlgmr.msra.gmra.mrb[4].mxu0 %vm4885_vm10, %v3504_v59  ;;  %v4421_v59 = vld [vmem:[#allocation5 + $0x1a8] sm:$0xff]  }
 0x438   :  { %4089 = vmatpush3.bf16.msra.mxu0 %v4408_v38  ;;  %4104 = vmatprep.mubr.msk.bf16.mxu0 %vm4897_vm12, %v3515_v8 }
 0x439   :  { %4090 = vmatprep.subr.bf16.mxu0 %v4409_v48  ;;  %4118 = vmatprep.subr.bf16.mxu1 %v4421_v59 }
 0x43a   :  { %4119 = vmatpush3.bf16.msra.mxu1 %v4421_v59 }
 0x43b   :  { %4120 = vmatprep.subr.bf16.mxu1 %v4422_v55 }
 0x43c   :  { %4091 = vmatpush3.bf16.msra.mxu0 %v4409_v48 }
 0x43d   :  { %4092 = vmatprep.subr.bf16.mxu0 %v4410_v50 }
 0x43e   :  { %4121 = vmatpush3.bf16.msra.mxu1 %v4422_v55 }
 0x43f   :  { %4122 = vmatprep.subr.bf16.mxu1 %v4423_v60 }
 0x440   :  { %4093 = vmatpush3.bf16.msra.mxu0 %v4410_v50 }
 0x441   :  { %4094 = vmatprep.subr.bf16.mxu0 %v4411_v13 }
 0x442   :  { %4123 = vmatpush3.bf16.msra.mxu1 %v4423_v60 }
 0x443   :  { %4128 = vmatprep.subr.bf16.mxu1 %v5207_v61 }
 0x444   :  { %4095 = vmatpush3.bf16.msra.mxu0 %v4411_v13 }
 0x445   :  { %4096 = vmatprep.subr.bf16.mxu0 %v4412_v51 }
 0x448   :  { %4097 = vmatpush3.bf16.msra.mxu0 %v4412_v51 }
 0x449   :  { %4098 = vmatprep.subr.bf16.mxu0 %v4413_v62 }
 0x44c   :  { %4099 = vmatpush3.bf16.msra.mxu0 %v4413_v62 }
 0x44d   :  { %4100 = vmatprep.subr.bf16.mxu0 %v4414_v52 }
 0x450   :  { %4101 = vmatpush3.bf16.msra.mxu0 %v4414_v52 }
 0x451   :  { %4102 = vmatprep.subr.bf16.mxu0 %v4415_v53 }
 0x454   :  { %4103 = vmatpush3.bf16.msra.mxu0 %v4415_v53 }
 0x457   :  { %4105 = vmatmul.mubr.msk.bf16.vlgmr.msra.gmra.mrb[4].mxu0 %vm4897_vm12, %v3518_v3 }
 0x458   :  { %3276 = vmatprep.mubr.bf16.mxu0 %v4613_v0 }
 0x52a   :  { %v4106_v2 = vpop.f32.mrb[4].mxu0 }
 0x52b   :  { %v2362_v4 = vadd.f32 %v4106_v2, %v3521_v63  ;;  %v2333_v5 = vpop.f32.mrb[5].mxu0 }
 0x52c   :  { %v2360_v6 = vadd.f32 %v3521_v63, %v2333_v5  ;;  %v4107_v1 = vpop.f32.mrb[6].mxu0 }
 0x52d   :  { %v2370_v8 = vmul.f32 0.044715, %v2362_v4  ;;  %v2363_v3 = vadd.f32 %v4107_v1, %v3521_v63  ;;  %v2336_v11 = vpop.f32.mrb[7].mxu0  ;;  %v2366_v42 = vmul.f32 0.5, %v2362_v4 }
 0x52e   :  { %v2368_v12 = vmul.f32 0.044715, %v2360_v6  ;;  %v2361_v14 = vadd.f32 %v3521_v63, %v2336_v11  ;;  %v2364_v38 = vmul.f32 0.5, %v2360_v6 }
 0x52f   :  { %v2374_v9 = vmul.f32 %v2370_v8, %v2362_v4  ;;  %v2371_v16 = vmul.f32 0.044715, %v2363_v3  ;;  %v2367_v51 = vmul.f32 0.5, %v2363_v3 }
 0x530   :  { %v2372_v17 = vmul.f32 %v2368_v12, %v2360_v6  ;;  %v2369_v19 = vmul.f32 0.044715, %v2361_v14  ;;  %v2365_v53 = vmul.f32 0.5, %v2361_v14 }
 0x531   :  { %v2378_v20 = vmul.f32 %v2374_v9, %v2362_v4  ;;  %v2375_v29 = vmul.f32 %v2371_v16, %v2363_v3 }
 0x532   :  { %v2376_v30 = vmul.f32 %v2372_v17, %v2360_v6  ;;  %v2373_v32 = vmul.f32 %v2369_v19, %v2361_v14 }
 0x533   :  { %v2382_v35 = vadd.f32 %v2378_v20, %v2362_v4  ;;  %v2379_v39 = vmul.f32 %v2375_v29, %v2363_v3 }
 0x534   :  { %v2380_v37 = vadd.f32 %v2376_v30, %v2360_v6  ;;  %v2377_v40 = vmul.f32 %v2373_v32, %v2361_v14 }
 0x535   :  { %v2386_v41 = vmul.f32 0.7978846, %v2382_v35  ;;  %v2383_v43 = vadd.f32 %v2379_v39, %v2363_v3 }
 0x536   :  { %v2384_v21 = vmul.f32 0.7978846, %v2380_v37  ;;  %v2381_v26 = vadd.f32 %v2377_v40, %v2361_v14  ;;  %v4425_v37 = vld [vmem:[#allocation5 + $0x148] sm:$0xff]  }
 0x537   :  { %4504 = vtanh.f32 %v2386_v41  ;;  %v2387_v44 = vmul.f32 0.7978846, %v2383_v43 }
 0x538   :  { %4506 = vtanh.f32 %v2384_v21  ;;  %v2385_v45 = vmul.f32 0.7978846, %v2381_v26 }
 0x539   :  { %4508 = vtanh.f32 %v2387_v44 }
 0x53a   :  { %4510 = vtanh.f32 %v2385_v45 }
 0x541   :  { %v4505_v24 = vpop.eup %4504 }
 0x542   :  { %v4507_v27 = vpop.eup %4506  ;;  %v2394_v33 = vadd.f32 1.0, %v4505_v24 }
 0x543   :  { %v4509_v25 = vpop.eup %4508  ;;  %v2392_v48 = vadd.f32 1.0, %v4507_v27 }
 0x544   :  { %v4511_v50 = vpop.eup %4510  ;;  %v5213_v13 = vmul.f32 %v2394_v33, %v2366_v42  ;;  %v2395_v62 = vadd.f32 1.0, %v4509_v25  ;;  %v4456_v33 = vld [vmem:[#allocation7] ss:$8 sps:$4 sm:$0xff]   ;;  %v4458_v25 = vld [vmem:[#allocation7 + $0x4] ss:$8 sps:$4 sm:$0xff]  }
 0x545   :  { %v5215_v52 = vmul.f32 %v2392_v48, %v2364_v38  ;;  %v2393_v34 = vadd.f32 1.0, %v4511_v50  ;;  %v4461_v48 = vld [vmem:[#allocation7 + $0x14] ss:$8 sps:$4 sm:$0xff]   ;;  %3244 = vmatprep.subr.bf16.mxu0 %v4458_v25 }
 0x546   :  { %v5217_v56 = vmul.f32 %v2395_v62, %v2367_v51  ;;  %v2433_v57 = vrot.slane %v5213_v13, 7  ;;  %v2402_v22 = vrot.slane %v5213_v13, 6  ;;  %v2778_v58 = vrot.slane %v5213_v13, 1  ;;  %v4426_v50 = vld [vmem:[#allocation5 + $0x150] sm:$0xff]   ;;  %3245 = vmatpush1.bf16.msra.mxu0 %v4456_v33 }
 0x547   :  { %v5222_v59 = vmul.f32 %v2393_v34, %v2365_v53  ;;  %v2431_v55 = vrot.slane %v5215_v52, 7  ;;  %v2400_v60 = vrot.slane %v5215_v52, 6  ;;  %v2776_v63 = vrot.slane %v5215_v52, 1  ;;  %v4459_v34 = vld [vmem:[#allocation7 + $0x10] ss:$8 sps:$4 sm:$0xff]   ;;  %3246 = vmatprep.subr.bf16.mxu0 %v4461_v48 }
 0x548   :  { %v2434_v2 = vrot.slane %v5217_v56, 7  ;;  %v2403_v4 = vrot.slane %v5217_v56, 6  ;;  %v2674_v5 = vpack.c.bf16 %v5217_v56, %v5213_v13  ;;  %v2779_v6 = vrot.slane %v5217_v56, 1 }
 0x549   :  { %v2432_v1 = vrot.slane %v5222_v59, 7  ;;  %v2401_v8 = vrot.slane %v5222_v59, 6  ;;  %v2673_v3 = vpack.c.bf16 %v5222_v59, %v5215_v52  ;;  %v2777_v11 = vrot.slane %v5222_v59, 1 }
 0x54a   :  { %v2438_v12 = vsel %vm291_vm1, %v2434_v2, %v2431_v55  ;;  %v2435_v14 = vsel %vm291_vm1, %v2433_v57, %v2434_v2  ;;  %v2407_v9 = vsel %vm260_vm3, %v2403_v4, %v2400_v60  ;;  %v5245_v16 = vsel %vm260_vm3, %v2402_v22, %v2403_v4  ;;  %3247 = vmatpush1.bf16.msra.mxu0 %v4459_v34  ;;  %v4470_v2 = vld [vmem:[#allocation7 + $0x44] ss:$8 sps:$4 sm:$0xff]  }
 0x54b   :  { %v2437_v17 = vsel %vm291_vm1, %v2431_v55, %v2432_v1  ;;  %v2436_v19 = vsel %vm291_vm1, %v2432_v1, %v2433_v57  ;;  %v2406_v20 = vsel %vm260_vm3, %v2400_v60, %v2401_v8  ;;  %v5255_v29 = vsel %vm260_vm3, %v2401_v8, %v2402_v22  ;;  %v4464_v57 = vld [vmem:[#allocation7 + $0x24] ss:$8 sps:$4 sm:$0xff]   ;;  %v4427_v22 = vld [vmem:[#allocation5 + $0x158] sm:$0xff]   ;;  %v4430_v1 = vld [vmem:[#allocation5 + $0x170] sm:$0xff]  }
 0x54c   :  { %v3531_v30 = vpack.c.bf16 %v2437_v17, %v2438_v12  ;;  %v3534_v32 = vpack.c.bf16 %v2435_v14, %v2436_v19  ;;  %v3545_v35 = vpack.c.bf16 %v2406_v20, %v2407_v9  ;;  %v3548_v39 = vpack.c.bf16 %v5245_v16, %v5255_v29  ;;  %3248 = vmatprep.subr.bf16.mxu0 %v4464_v57  ;;  %v4467_v55 = vld [vmem:[#allocation7 + $0x34] ss:$8 sps:$4 sm:$0xff]   ;;  %v4428_v60 = vld [vmem:[#allocation5 + $0x160] sm:$0xff]   ;;  %v4429_v4 = vld [vmem:[#allocation5 + $0x168] sm:$0xff]  }
 0x54d   :  { %v5261_v40 = vsel %vm637_vm8, %v2777_v11, %v2778_v58  ;;  %v5265_v41 = vsel %vm637_vm8, %v2776_v63, %v2777_v11  ;;  %v5269_v43 = vsel %vm637_vm8, %v2778_v58, %v2779_v6  ;;  %v5273_v21 = vsel %vm637_vm8, %v2779_v6, %v2776_v63  ;;  %v4462_v58 = vld [vmem:[#allocation7 + $0x20] ss:$8 sps:$4 sm:$0xff]   ;;  %v4465_v63 = vld [vmem:[#allocation7 + $0x30] ss:$8 sps:$4 sm:$0xff]  }
 0x54e   :  { %4124 = vmatprep.mubr.msk.bf16.mxu1 %vm4822_vm6, %v3531_v30  ;;  %v3567_v26 = vpack.c.bf16 %v5261_v40, %v5265_v41  ;;  %v3570_v44 = vpack.c.bf16 %v5273_v21, %v5269_v43  ;;  %v2908_v45 = vrot.slane %v5215_v52, 2  ;;  %v2909_v24 = vrot.slane %v5222_v59, 2  ;;  %3249 = vmatpush1.bf16.msra.mxu0 %v4462_v58  ;;  %v4468_v6 = vld [vmem:[#allocation7 + $0x40] ss:$8 sps:$4 sm:$0xff]   ;;  %v4431_v8 = vld [vmem:[#allocation5 + $0x178] sm:$0xff]   ;;  %v4434_v14 = vld [vmem:[#allocation5 + $0x1d0] sm:$0xff]  }
 0x54f   :  { %4125 = vmatmul.mubr.msk.bf16.vlgmr.msra.gmra.mrb[8].mxu1 %vm4822_vm6, %v3534_v32  ;;  %v2910_v27 = vrot.slane %v5213_v13, 2  ;;  %v2911_v42 = vrot.slane %v5217_v56, 2  ;;  %3250 = vmatprep.subr.bf16.mxu0 %v4467_v55  ;;  %v4432_v11 = vld [vmem:[#allocation5 + $0x1c0] sm:$0xff]   ;;  %v4433_v12 = vld [vmem:[#allocation5 + $0x1c8] sm:$0xff]   ;;  %v4435_v9 = vld [vmem:[#allocation5 + $0x1d8] sm:$0xff]   ;;  %v3097_v33 = vcombine.high %v3591_v7, %v3591_v7 }
 0x550   :  { %4129 = vmatpush3.bf16.msra.mxu1 %v5207_v61  ;;  %4144 = vmatprep.mubr.msk.bf16.mxu1 %vm4842_vm7, %v3545_v35  ;;  %v5292_v38 = vsel %vm770_vm2, %v2908_v45, %v2909_v24  ;;  %v4436_v17 = vld [vmem:[#allocation5 + $0x1e0] sm:$0xff]   ;;  %v4437_v19 = vld [vmem:[#allocation5 + $0x1e8] sm:$0xff]   ;;  %v4439_v16 = vld [vmem:[#allocation5 + $0x1f8] sm:$0xff]  }
 0x551   :  { %4130 = vmatprep.subr.bf16.mxu1 %v4425_v37  ;;  %v5296_v15 = vsel %vm770_vm2, %v2909_v24, %v2910_v27  ;;  %v5300_v51 = vsel %vm770_vm2, %v2910_v27, %v2911_v42  ;;  %v5304_v61 = vsel %vm770_vm2, %v2911_v42, %v2908_v45  ;;  %v4440_v52 = vld [vmem:[#allocation5 + $0x200] sm:$0xff]   ;;  %v4441_v59 = vld [vmem:[#allocation5 + $0x208] sm:$0xff]   ;;  %v4443_v20 = vld [vmem:[#allocation5 + $0x218] sm:$0xff]   ;;  %v3111_v48 = vrot.slane %v3097_v33, %v5045_v10 }
 0x552   :  { %v3581_v62 = vpack.c.bf16 %v5296_v15, %v5292_v38  ;;  %v3584_v53 = vpack.c.bf16 %v5304_v61, %v5300_v51  ;;  %3251 = vmatpush1.bf16.msra.mxu0 %v4465_v63  ;;  %v4444_v29 = vld [vmem:[#allocation5 + $0x220] sm:$0xff]   ;;  %v4445_v30 = vld [vmem:[#allocation5 + $0x228] sm:$0xff]   ;;  %v4446_v13 = vld [vmem:[#allocation5 + $0x230] sm:$0xff]   ;;  %v3104_v15 = vrot.slane %v3591_v7, %v5045_v10 }
 0x553   :  { %3252 = vmatprep.subr.bf16.mxu0 %v4470_v2  ;;  %v4447_v56 = vld [vmem:[#allocation5 + $0x238] sm:$0xff]   ;;  %v4449_v32 = vld [vmem:[#allocation5 + $0x248] sm:$0xff]   ;;  %v4450_v35 = vld [vmem:[#allocation5 + $0x250] sm:$0xff]   ;;  %v3119_v34 = vrot.slane %v3111_v48, %v4745_v31 }
 0x554   :  { %4131 = vmatpush3.bf16.msra.mxu1 %v4425_v37  ;;  %v4452_v37 = vld [vmem:[#allocation5 + $0x260] sm:$0xff]   ;;  %v4453_v40 = vld [vmem:[#allocation5 + $0x268] sm:$0xff]   ;;  %v4455_v41 = vld [vmem:[#allocation5 + $0x278] sm:$0xff]   ;;  %v3115_v58 = vrot.slane %v3104_v15, %v4745_v31 }
 0x555   :  { %4132 = vmatprep.subr.bf16.mxu1 %v4426_v50  ;;  %v4471_v43 = vld [vmem:[#allocation7 + $0x50] ss:$8 sps:$4 sm:$0xff]   ;;  %v4473_v21 = vld [vmem:[#allocation7 + $0x54] ss:$8 sps:$4 sm:$0xff]  }
 0x556   :  { %3253 = vmatpush1.bf16.msra.mxu0 %v4468_v6  ;;  %v4479_v45 = vld [vmem:[#allocation7 + $0x74] ss:$8 sps:$4 sm:$0xff]   ;;  %v4477_v24 = vld [vmem:[#allocation7 + $0x70] ss:$8 sps:$4 sm:$0xff]  }
 0x557   :  { %3254 = vmatprep.subr.bf16.mxu0 %v4473_v21  ;;  %v3589_v27 = vld.sshfl [vmem:[%s5382_s1 + $0x2] sm:$0x11 pattern:$0x75316420] }
 0x558   :  { %4133 = vmatpush3.bf16.msra.mxu1 %v4426_v50  ;;  %v3062_v42 = vcombine.high %v3589_v27, %v3589_v27  ;;  %v3069_v38 = vrot.slane %v3589_v27, %v5045_v10  ;;  %v3587_v50 = vld [vmem:[%s5389_s8 + $0x1] ss:$0 sm:$0xff]  ;;  %s4619_s8 = smov [#allocation8]  }
 0x559   :  { %4134 = vmatprep.subr.bf16.mxu1 %v4427_v22 }
 0x55a   :  { %3255 = vmatpush1.bf16.msra.mxu0 %v4471_v43  ;;  %v3076_v25 = vrot.slane %v3062_v42, %v5045_v10 }
 0x55c   :  { %4135 = vmatpush3.bf16.msra.mxu1 %v4427_v22  ;;  %v3084_v51 = vrot.slane %v3076_v25, %v4745_v31 }
 0x55d   :  { %4136 = vmatprep.subr.bf16.mxu1 %v4428_v60 }
 0x560   :  { %4137 = vmatpush3.bf16.msra.mxu1 %v4428_v60 }
 0x561   :  { %4138 = vmatprep.subr.bf16.mxu1 %v4429_v4 }
 0x564   :  { %4139 = vmatpush3.bf16.msra.mxu1 %v4429_v4 }
 0x565   :  { %4140 = vmatprep.subr.bf16.mxu1 %v4430_v1 }
 0x568   :  { %4141 = vmatpush3.bf16.msra.mxu1 %v4430_v1 }
 0x569   :  { %4142 = vmatprep.subr.bf16.mxu1 %v4431_v8 }
 0x56c   :  { %4143 = vmatpush3.bf16.msra.mxu1 %v4431_v8 }
 0x56d   :  { %4148 = vmatprep.subr.bf16.mxu1 %v4432_v11 }
 0x56f   :  { %4145 = vmatmul.mubr.msk.bf16.vlgmr.msra.gmra.mrb[8].mxu1 %vm4842_vm7, %v3548_v39  ;;  %v4451_v39 = vld [vmem:[#allocation5 + $0x258] sm:$0xff]  }
 0x570   :  { %4149 = vmatpush3.bf16.msra.mxu1 %v4432_v11  ;;  %4164 = vmatprep.mubr.bf16.mxu1 %v2673_v3  ;;  %v4442_v3 = vld [vmem:[#allocation5 + $0x210] sm:$0xff]  }
 0x571   :  { %4150 = vmatprep.subr.bf16.mxu1 %v4433_v12 }
 0x574   :  { %4151 = vmatpush3.bf16.msra.mxu1 %v4433_v12 }
 0x575   :  { %4152 = vmatprep.subr.bf16.mxu1 %v4434_v14 }
 0x578   :  { %4153 = vmatpush3.bf16.msra.mxu1 %v4434_v14 }
 0x579   :  { %4154 = vmatprep.subr.bf16.mxu1 %v4435_v9 }
 0x57c   :  { %4155 = vmatpush3.bf16.msra.mxu1 %v4435_v9 }
 0x57d   :  { %4156 = vmatprep.subr.bf16.mxu1 %v4436_v17 }
 0x580   :  { %4157 = vmatpush3.bf16.msra.mxu1 %v4436_v17 }
 0x581   :  { %4158 = vmatprep.subr.bf16.mxu1 %v4437_v19 }
 0x584   :  { %4159 = vmatpush3.bf16.msra.mxu1 %v4437_v19 }
 0x585   :  { %4160 = vmatprep.subr.bf16.mxu1 %v4438_v23 }
 0x588   :  { %4161 = vmatpush3.bf16.msra.mxu1 %v4438_v23 }
 0x589   :  { %4162 = vmatprep.subr.bf16.mxu1 %v4439_v16 }
 0x58c   :  { %4163 = vmatpush3.bf16.msra.mxu1 %v4439_v16 }
 0x58d   :  { %4168 = vmatprep.subr.bf16.mxu1 %v4440_v52 }
 0x58f   :  { %4165 = vmatmul.mubr.bf16.vlgmr.msra.gmra.mrb[8].mxu1 %v2674_v5  ;;  %v4448_v5 = vld [vmem:[#allocation5 + $0x240] sm:$0xff]  }
 0x590   :  { %4169 = vmatpush3.bf16.msra.mxu1 %v4440_v52  ;;  %4184 = vmatprep.mubr.msk.bf16.mxu1 %vm4885_vm10, %v3567_v26  ;;  %v4476_v26 = vld [vmem:[#allocation7 + $0x64] ss:$8 sps:$4 sm:$0xff]  }
 0x591   :  { %4170 = vmatprep.subr.bf16.mxu1 %v4441_v59  ;;  %3256 = vmatprep.subr.bf16.mxu0 %v4476_v26 }
 0x594   :  { %4171 = vmatpush3.bf16.msra.mxu1 %v4441_v59  ;;  %v3152_v59 = vld [vmem:[%s5391_s10] sm:$0x3]  ;;  %s3310_s10 = sshll.u32 %s4619_s8, 4  ;;  %s3311_s10 = int_to_ptr.vmem [resolvable:$true] %s3310_s10 }
 0x595   :  { %4172 = vmatprep.subr.bf16.mxu1 %v4442_v3  ;;  %s4578_s21 = scalar_lea.vmem %s3311_s10, 1024  ;;  %p4583_p11 = scmp.lt.s32.totalorder %s3311_s10, %s3311_s10 }
 0x596   :  { %p4579_p10 = scmp.ne.s32.totalorder %s3311_s10, %s4578_s21  ;;  %p4584_p12 = scmp.lt.s32.totalorder %s4578_s21, %s4578_s21 }
 0x598   :  { %4173 = vmatpush3.bf16.msra.mxu1 %v4442_v3  ;;  %v3157_v3 = vrot.slane %v3152_v59, %v4745_v31  ;;  %p4585_p13 = por %p4584_p12, %p4583_p11 }
 0x599   :  { %4174 = vmatprep.subr.bf16.mxu1 %v4443_v20 }
 0x59a   :  { %p4586_p0 = pnand %p4585_p13, %p4579_p10 }
 0x59c   :  { %4175 = vmatpush3.bf16.msra.mxu1 %v4443_v20 }
 0x59d   :  { %4176 = vmatprep.subr.bf16.mxu1 %v4444_v29 }
 0x5a0   :  { %4177 = vmatpush3.bf16.msra.mxu1 %v4444_v29 }
 0x5a1   :  { %4178 = vmatprep.subr.bf16.mxu1 %v4445_v30 }
 0x5a4   :  { %4179 = vmatpush3.bf16.msra.mxu1 %v4445_v30 }
 0x5a5   :  { %4180 = vmatprep.subr.bf16.mxu1 %v4446_v13 }
 0x5a8   :  { %4181 = vmatpush3.bf16.msra.mxu1 %v4446_v13 }
 0x5a9   :  { %4182 = vmatprep.subr.bf16.mxu1 %v4447_v56 }
 0x5ac   :  { %4183 = vmatpush3.bf16.msra.mxu1 %v4447_v56 }
 0x5ad   :  { %4188 = vmatprep.subr.bf16.mxu1 %v4448_v5 }
 0x5af   :  { %4185 = vmatmul.mubr.msk.bf16.vlgmr.msra.gmra.mrb[8].mxu1 %vm4885_vm10, %v3570_v44  ;;  %v4474_v44 = vld [vmem:[#allocation7 + $0x60] ss:$8 sps:$4 sm:$0xff]  }
 0x5b0   :  { %4189 = vmatpush3.bf16.msra.mxu1 %v4448_v5  ;;  %4204 = vmatprep.mubr.msk.bf16.mxu1 %vm4897_vm12, %v3581_v62  ;;  %v3080_v62 = vrot.slane %v3069_v38, %v4745_v31 }
 0x5b1   :  { %4190 = vmatprep.subr.bf16.mxu1 %v4449_v32  ;;  %3257 = vmatpush1.bf16.msra.mxu0 %v4474_v44 }
 0x5b2   :  { %3258 = vmatprep.subr.bf16.mxu0 %v4479_v45 }
 0x5b4   :  { %4191 = vmatpush3.bf16.msra.mxu1 %v4449_v32 }
 0x5b5   :  { %4192 = vmatprep.subr.bf16.mxu1 %v4450_v35  ;;  %3259 = vmatpush1.bf16.msra.mxu0 %v4477_v24 }
 0x5b8   :  { %4193 = vmatpush3.bf16.msra.mxu1 %v4450_v35 }
 0x5b9   :  { %4194 = vmatprep.subr.bf16.mxu1 %v4451_v39 }
 0x5bc   :  { %4195 = vmatpush3.bf16.msra.mxu1 %v4451_v39 }
 0x5bd   :  { %4196 = vmatprep.subr.bf16.mxu1 %v4452_v37 }
 0x5c0   :  { %4197 = vmatpush3.bf16.msra.mxu1 %v4452_v37 }
 0x5c1   :  { %4198 = vmatprep.subr.bf16.mxu1 %v4453_v40 }
 0x5c4   :  { %4199 = vmatpush3.bf16.msra.mxu1 %v4453_v40 }
 0x5c5   :  { %4200 = vmatprep.subr.bf16.mxu1 %v4454_v54 }
 0x5c8   :  { %4201 = vmatpush3.bf16.msra.mxu1 %v4454_v54 }
 0x5c9   :  { %4202 = vmatprep.subr.bf16.mxu1 %v4455_v41 }
 0x5cc   :  { %4203 = vmatpush3.bf16.msra.mxu1 %v4455_v41 }
 0x5cf   :  { %4205 = vmatmul.mubr.msk.bf16.vlgmr.msra.gmra.mrb[8].mxu1 %vm4897_vm12, %v3584_v53 }
 0x6a2   :  { %v4206_v61 = vpop.f32.mrb[8].mxu1 }
 0x6a3   :  { %v3050_v53 = vadd.f32 %v4206_v61, %v3587_v50  ;;  %v3021_v57 = vpop.f32.mrb[9].mxu1 }
 0x6a4   :  { %v3048_v22 = vadd.f32 %v3587_v50, %v3021_v57  ;;  %v4207_v55 = vpop.f32.mrb[10].mxu1 }
 0x6a5   :  { %v3124_v60 = vmul.f32 %v3084_v51, %v3050_v53  ;;  %v3051_v63 = vadd.f32 %v4207_v55, %v3587_v50  ;;  %v3024_v2 = vpop.f32.mrb[11].mxu1 }
 0x6a6   :  { %v3122_v4 = vmul.f32 %v3080_v62, %v3048_v22  ;;  %v3049_v6 = vadd.f32 %v3587_v50, %v3024_v2 }
 0x6a7   :  { %v3128_v1 = vadd.f32 %v3124_v60, %v3119_v34  ;;  %v3125_v10 = vmul.f32 %v3084_v51, %v3051_v63 }
 0x6a8   :  { %v3126_v8 = vadd.f32 %v3122_v4, %v3115_v58  ;;  %v3123_v11 = vmul.f32 %v3080_v62, %v3049_v6 }
 0x6a9   :  { %v3129_v12 = vadd.f32 %v3125_v10, %v3119_v34  ;;  %v3132_v9 = vadd.f32 %v3128_v1, %v5059_v46  ;;  %v3161_v46 = vrot.slane %v3152_v59, %v143_v36 }
 0x6aa   :  { %v3127_v14 = vadd.f32 %v3123_v11, %v3115_v58  ;;  %v3130_v19 = vadd.f32 %v3126_v8, %v5062_v18 }
 0x6ab   :  { %v3133_v17 = vadd.f32 %v3129_v12, %v5066_v47 }
 0x6ac   :  { %v3131_v23 = vadd.f32 %v3127_v14, %v5070_v49 }
 0x6ad   :  { %v3151_v16 = vpack.c.bf16 %v3133_v17, %v3132_v9 }
 0x6ae   :  { %v3150_v52 = vpack.c.bf16 %v3131_v23, %v3130_v19 }
 0x6b0   :  { %3277 = vmatmul.mubr.bf16.vlgmr.msra.gmra.mrb[8].mxu0 %v3150_v52 }
 0x6b1   :  { %3286 = vmatprep.mubr.bf16.mxu0 %v4613_v0 }
 0x6b8   :  { %3287 = vmatmul.mubr.bf16.gmra.mrb[12].mxu0 %v3151_v16 }
 0x783   :  { %v3278_v47 = vpop.f32.mrb[8].mxu0 }
 0x784   :  { %v3279_v20 = vadd.f32 %v3278_v47, %v3157_v3  ;;  %v3280_v18 = vpop.f32.mrb[9].mxu0 }
 0x785   :  { %v3281_v29 = vadd.f32 %v3280_v18, %v3161_v46  ;;  %v3282_v49 = vpop.f32.mrb[10].mxu0 }
 0x786   :  { %3297 = vst [vmem:[#allocation8] sm:$0xff] %v3279_v20  ;;  %v3283_v30 = vadd.f32 %v3282_v49, %v3157_v3  ;;  %v3284_v13 = vpop.f32.mrb[11].mxu0 }
 0x787   :  { %3298 = vst [vmem:[#allocation8 + $0x8] sm:$0xff] %v3281_v29  ;;  %v3285_v0 = vadd.f32 %v3284_v13, %v3161_v46 }
 0x788   :  { %3299 = vst [vmem:[#allocation8 + $0x10] sm:$0xff] %v3283_v30 }
 0x789   :  { %3300 = vst [vmem:[#allocation8 + $0x18] sm:$0xff] %v3285_v0 }
 0x78b   :  { %v3288_v56 = vpop.f32.mrb[12].mxu0 }
 0x78c   :  { %v3289_v5 = vadd.f32 %v3288_v56, %v3157_v3  ;;  %v3290_v32 = vpop.f32.mrb[13].mxu0 }
 0x78d   :  { %v3291_v31 = vadd.f32 %v3290_v32, %v3161_v46  ;;  %v3292_v28 = vpop.f32.mrb[14].mxu0 }
 0x78e   :  { %3301 = vst [vmem:[#allocation8 + $0x20] sm:$0xff] %v3289_v5  ;;  %v3293_v36 = vadd.f32 %v3292_v28, %v3157_v3  ;;  %v3294_v35 = vpop.f32.mrb[15].mxu0 }
 0x78f   :  { %3302 = vst [vmem:[#allocation8 + $0x28] sm:$0xff] %v3291_v31  ;;  %v3295_v39 = vadd.f32 %v3294_v35, %v3161_v46 }
 0x790   :  { %3303 = vst [vmem:[#allocation8 + $0x30] sm:$0xff] %v3293_v36 }
 0x791   :  { %3304 = vst [vmem:[#allocation8 + $0x38] sm:$0xff] %v3295_v39 }
 0x792   :  { %4589 = shalt.err (!%p4586_p0)
}
 0x793   :  { %s4590_s23 = scalar_lea.hbm %s5392_s11, 1024 }
 0x794   :  { %p4591_p1 = scmp.ne.s32.totalorder %s5392_s11, %s4590_s23  ;;  %p4594_p2 = scmp.lt.u32.totalorder %s4590_s23, %s5392_s11 }
 0x796   :  { %p4596_p3 = pnand %p4594_p2, %p4591_p1 }
 0x798   :  { %4599 = shalt.err (!%p4596_p3)
}
 0x799   :  { %s4620_s25 = smov 256   ;;  %s4621_s26 = smov 16  }
 0x79a   :  { %3316 = dma.vmem_to_hbm [thread:$0]  %s3311_s10, 1024, %s5392_s11, [#allocation4], %s4620_s25, %s4620_s25, %s4621_s26  }
 0x79b   :  { %4604 = dma.done.wait [#allocation4], 1024  }
 0x79c   :  { %4605 = vsyncadd [#allocation4], 4294966272 }
 0x79d   :  { %3320 = vsyncpa [#allocation3], 1 }
 0x79e   :  { %3321 = vsyncpa [#allocation6], 1 }
 0x79f   :  { %3322 = vsyncpa [#allocation4], 1 }

</bundles_post_ra>
